<compile_context>
chip_gen: v7x
topology: tpu7x:2x2x1
jax: 0.10.0
libtpu: 0.0.40
codegen_flags: <defaults>
</compile_context>

<pallas_src>
import functools
import math

import jax
import jax.numpy as jnp
from jax.experimental import pallas as pl
from jax.experimental.pallas import tpu as pltpu


CFG = dict(
    embed_dim=32,     # 768 in dinov2_vitb14
    adapter_dim=16,   # 128 in Adapter
    num_heads=4,      # 12
    depth=2,          # 12
    mlp_ratio=4,
    patch=4,          # 14
    num_classes=10,
    img=16,
    in_chans=3,
)


# ----------------------------------------------------------------------------
# In-kernel helpers (pure functions on loaded values)
# ----------------------------------------------------------------------------
def _gelu(x):
    # nn.GELU() default: exact erf-based GELU (f32 elementwise).
    return 0.5 * x * (1.0 + jax.lax.erf(x * 0.7071067811865475))


def _layernorm(x, g, b):
    mu = jnp.mean(x, axis=-1, keepdims=True)
    var = jnp.mean(jnp.square(x - mu), axis=-1, keepdims=True)
    return (x - mu) * jax.lax.rsqrt(var + 1e-6) * g + b


def _mm(x_f32, w_ref, b_ref):
    # bf16 MXU inputs (weights already stored bf16), f32 accumulate + bias.
    return jnp.dot(x_f32.astype(jnp.bfloat16), w_ref[...],
                   preferred_element_type=jnp.float32) + b_ref[...]


def _adapter(x, w1_ref, b1_ref, w2_ref, b2_ref):
    # Adapter.forward: x + Linear(GELU(Linear(x)))
    return x + _mm(_gelu(_mm(x, w1_ref, b1_ref)), w2_ref, b2_ref)


# ----------------------------------------------------------------------------
# Pallas kernels
# ----------------------------------------------------------------------------
def _embed_kernel(p_ref, w_ref, b_ref, cls_ref, pos_ref, o_ref):
    # p: (1, Np, C*P*P)  w: (C*P*P, D) bf16  b/cls: (1, D)  pos: (T, D)
    tok = jnp.dot(p_ref[0].astype(jnp.bfloat16), w_ref[...],
                  preferred_element_type=jnp.float32) + b_ref[...]
    seq = jnp.concatenate([cls_ref[...], tok], axis=0) + pos_ref[...]
    o_ref[0] = seq.astype(o_ref.dtype)


def _block_kernel(*refs, num_heads, scale):
    (x_ref,
     n1w, n1b, qw, qb, kw, kb, vw, vb, pw, pb, ls1,
     aw1, ab1, aw2, ab2,
     n2w, n2b, f1w, f1b, f2w, f2b, ls2,
     mw1, mb1, mw2, mb2,
     o_ref) = refs

    x = x_ref[0].astype(jnp.float32)                      # (T, D)
    T, D = x.shape

    # ---- attention branch: norm1 -> per-head attn (+fused out-proj) ----
    y = _layernorm(x, n1w[...], n1b[...])
    yb = y.astype(jnp.bfloat16)
    acc = jnp.zeros((T, D), jnp.float32)
    for h in range(num_heads):                            # static unroll (H small)
        qh = jnp.dot(yb, qw[h], preferred_element_type=jnp.float32) + qb[h]
        kh = jnp.dot(yb, kw[h], preferred_element_type=jnp.float32) + kb[h]
        vh = jnp.dot(yb, vw[h], preferred_element_type=jnp.float32) + vb[h]
        s = jax.lax.dot_general(                          # q @ k^T, f32 acc
            qh.astype(jnp.bfloat16), kh.astype(jnp.bfloat16),
            (((1,), (1,)), ((), ())),
            preferred_element_type=jnp.float32) * scale   # (T, T)
        s = s - jnp.max(s, axis=-1, keepdims=True)
        p = jnp.exp(s)
        p = p * pl.reciprocal(jnp.sum(p, axis=-1, keepdims=True), approx=True)
        oh = jnp.dot(p.astype(jnp.bfloat16), vh.astype(jnp.bfloat16),
                     preferred_element_type=jnp.float32)  # (T, Dh)
        # fold the per-head slice of the output projection into the loop:
        acc = acc + jnp.dot(oh.astype(jnp.bfloat16), pw[h],
                            preferred_element_type=jnp.float32)
    a = acc + pb[...]                                     # out-proj bias
    a = _adapter(a, aw1, ab1, aw2, ab2)                   # Adaptor_Attn
    x = x + ls1[...] * a                                  # LayerScale + residual

    # ---- mlp branch: norm2 -> fc1/GELU/fc2 -> adapter -> ls + residual ----
    y = _layernorm(x, n2w[...], n2b[...])
    m = _mm(_gelu(_mm(y, f1w, f1b)), f2w, f2b)
    m = _adapter(m, mw1, mb1, mw2, mb2)                   # Adaptor_MLP
    x = x + ls2[...] * m

    o_ref[0] = x.astype(o_ref.dtype)


def _head_kernel(x_ref, nw, nb, hw, hb, o_ref):
    # final norm on the cls token (LN is per-token) + classification matmul.
    cls = x_ref[...][:, 0, :].astype(jnp.float32)         # (B, D)
    y = _layernorm(cls, nw[...], nb[...])
    o_ref[...] = (jnp.dot(y.astype(jnp.bfloat16), hw[...],
                          preferred_element_type=jnp.float32) + hb[...]
                  ).astype(o_ref.dtype)


# ----------------------------------------------------------------------------
# pallas_call wrappers
# ----------------------------------------------------------------------------
def _vmem_spec():
    return pl.BlockSpec(memory_space=pltpu.MemorySpace.VMEM)


def _rep_spec(arr):
    # full-array block, same for every grid step (tiny, stays VMEM-resident)
    n = arr.ndim
    return pl.BlockSpec(arr.shape, lambda b: (0,) * n)


def patch_embed(patches, ep):
    B, Np, CPP = patches.shape
    T, D = ep["pos"].shape
    args = (ep["w"], ep["b"], ep["cls"], ep["pos"])
    return pl.pallas_call(
        _embed_kernel,
        grid=(B,),
        out_shape=jax.ShapeDtypeStruct((B, T, D), jnp.float32),
        in_specs=[pl.BlockSpec((1, Np, CPP), lambda b: (b, 0, 0))]
        + [_rep_spec(a) for a in args],
        out_specs=pl.BlockSpec((1, T, D), lambda b: (b, 0, 0)),
        compiler_params=pltpu.CompilerParams(dimension_semantics=("parallel",)),
    )(patches, *args)


def block_forward(xseq, blk, cfg):
    B, T, D = xseq.shape
    H = cfg["num_heads"]
    scale = 1.0 / math.sqrt(D // H)
    xspec = pl.BlockSpec((1, T, D), lambda b: (b, 0, 0))
    return pl.pallas_call(
        functools.partial(_block_kernel, num_heads=H, scale=scale),
        grid=(B,),
        out_shape=jax.ShapeDtypeStruct((B, T, D), xseq.dtype),
        in_specs=[xspec] + [_rep_spec(a) for a in blk],
        out_specs=xspec,
        compiler_params=pltpu.CompilerParams(dimension_semantics=("parallel",)),
    )(xseq, *blk)


def head_forward(xseq, hp):
    B, T, D = xseq.shape
    nc = hp["w"].shape[1]
    args = (hp["norm_w"], hp["norm_b"], hp["w"], hp["b"])
    return pl.pallas_call(
        _head_kernel,
        out_shape=jax.ShapeDtypeStruct((B, nc), jnp.float32),
        in_specs=[_vmem_spec()] * 5,
        out_specs=_vmem_spec(),
    )(xseq, *args)


# ----------------------------------------------------------------------------
# Parameters: torch-layout init, then one-time kernel-layout preparation
# ----------------------------------------------------------------------------
def init_params(key, cfg):
    D = cfg["embed_dim"]
    A = cfg["adapter_dim"]
    Hid = cfg["mlp_ratio"] * D
    P = cfg["patch"]
    C = cfg["in_chans"]
    T = 1 + (cfg["img"] // P) ** 2

    keys = iter(jax.random.split(key, 256))

    def nrm(shape, std):
        return (std * jax.random.normal(next(keys), shape)).astype(jnp.float32)

    def adapter_params():
        # torch.nn.init.normal_(param, mean=0, std=0.001) for ALL Adapter params
        return dict(w1=nrm((A, D), 0.001), b1=nrm((A,), 0.001),
                    w2=nrm((D, A), 0.001), b2=nrm((D,), 0.001))

    def block_params():
        return dict(
            norm1_w=jnp.ones((D,), jnp.float32), norm1_b=jnp.zeros((D,), jnp.float32),
            qkv_w=nrm((3 * D, D), 0.02), qkv_b=jnp.zeros((3 * D,), jnp.float32),
            proj_w=nrm((D, D), 0.02), proj_b=jnp.zeros((D,), jnp.float32),
            ls1=jnp.full((D,), 1e-5, jnp.float32),
            adapt_attn=adapter_params(),
            norm2_w=jnp.ones((D,), jnp.float32), norm2_b=jnp.zeros((D,), jnp.float32),
            fc1_w=nrm((Hid, D), 0.02), fc1_b=jnp.zeros((Hid,), jnp.float32),
            fc2_w=nrm((D, Hid), 0.02), fc2_b=jnp.zeros((D,), jnp.float32),
            ls2=jnp.full((D,), 1e-5, jnp.float32),
            adapt_mlp=adapter_params(),
        )

    return dict(
        patch_w=nrm((D, C * P * P), 0.02),
        patch_b=jnp.zeros((D,), jnp.float32),
        cls_token=nrm((1, 1, D), 0.02),
        pos_embed=nrm((1, T, D), 0.02),
        blocks=[block_params() for _ in range(cfg["depth"])],
        norm_w=jnp.ones((D,), jnp.float32),
        norm_b=jnp.zeros((D,), jnp.float32),
        head_w=nrm((cfg["num_classes"], D), 0.02),
        head_b=jnp.zeros((cfg["num_classes"],), jnp.float32),
    )


def prepare_params(p, cfg):
    """One-time (outside jit): transpose to (K,N), split per head, cast to bf16."""
    D = cfg["embed_dim"]
    H = cfg["num_heads"]
    Dh = D // H
    bf16, f32 = jnp.bfloat16, jnp.float32

    def lin_t(w, b):
        return w.T.astype(bf16), b.reshape(1, -1).astype(f32)

    def row(v):
        return v.reshape(1, -1).astype(f32)

    blocks = []
    for bp in p["blocks"]:
        qkv_w, qkv_b = bp["qkv_w"], bp["qkv_b"]

        def heads_of(off):
            w = qkv_w[off:off + D].reshape(H, Dh, D).transpose(0, 2, 1).astype(bf16)
            b = qkv_b[off:off + D].reshape(H, 1, Dh).astype(f32)
            return w, b                                   # (H, D, Dh), (H, 1, Dh)

        qw, qb = heads_of(0)
        kw, kb = heads_of(D)
        vw, vb = heads_of(2 * D)
        pw = bp["proj_w"].T.reshape(H, Dh, D).astype(bf16)   # per-head rows of Wp^T
        pb = row(bp["proj_b"])
        aw1, ab1 = lin_t(bp["adapt_attn"]["w1"], bp["adapt_attn"]["b1"])
        aw2, ab2 = lin_t(bp["adapt_attn"]["w2"], bp["adapt_attn"]["b2"])
        f1w, f1b = lin_t(bp["fc1_w"], bp["fc1_b"])
        f2w, f2b = lin_t(bp["fc2_w"], bp["fc2_b"])
        mw1, mb1 = lin_t(bp["adapt_mlp"]["w1"], bp["adapt_mlp"]["b1"])
        mw2, mb2 = lin_t(bp["adapt_mlp"]["w2"], bp["adapt_mlp"]["b2"])
        blocks.append((
            row(bp["norm1_w"]), row(bp["norm1_b"]),
            qw, qb, kw, kb, vw, vb, pw, pb, row(bp["ls1"]),
            aw1, ab1, aw2, ab2,
            row(bp["norm2_w"]), row(bp["norm2_b"]),
            f1w, f1b, f2w, f2b, row(bp["ls2"]),
            mw1, mb1, mw2, mb2,
        ))

    pe_w, pe_b = lin_t(p["patch_w"], p["patch_b"])
    hd_w, hd_b = lin_t(p["head_w"], p["head_b"])
    return dict(
        embed=dict(w=pe_w, b=pe_b,
                   cls=p["cls_token"].reshape(1, D).astype(f32),
                   pos=p["pos_embed"].reshape(-1, D).astype(f32)),
        blocks=tuple(blocks),
        head=dict(norm_w=row(p["norm_w"]), norm_b=row(p["norm_b"]),
                  w=hd_w, b=hd_b),
    )


# ----------------------------------------------------------------------------
# Forward
# ----------------------------------------------------------------------------
def ensemble_forward(x, kp, cfg):
    """x: (B, C, H, W) float32 NCHW -> (B, num_classes) logits."""
    B, C, Himg, Wimg = x.shape
    P = cfg["patch"]
    nh, nw = Himg // P, Wimg // P

    # conv(P, stride=P) patch embed == unfold (XLA glue, once) + in-kernel matmul
    patches = (x.reshape(B, C, nh, P, nw, P)
                 .transpose(0, 2, 4, 1, 3, 5)
                 .reshape(B, nh * nw, C * P * P))
    xseq = patch_embed(patches, kp["embed"])              # (B, T, D) with cls+pos

    for blk in kp["blocks"]:
        xseq = block_forward(xseq, blk, cfg)              # 1 fused kernel / block

    return head_forward(xseq, kp["head"])                 # final LN(cls) + head


if __name__ == "__main__":
    key = jax.random.PRNGKey(0)
    pkey, xkey = jax.random.split(key)
    params = init_params(pkey, CFG)
    kparams = prepare_params(params, CFG)   # weight layout prep done once, outside jit
    x = jax.random.normal(xkey, (2, 3, 16, 16), dtype=jnp.float32)  # NCHW

    fwd = jax.jit(functools.partial(ensemble_forward, cfg=CFG))
    logits = fwd(x, kparams)
    jax.block_until_ready(logits)
    assert logits.shape == (2, CFG["num_classes"]), logits.shape
    assert bool(jnp.all(jnp.isfinite(logits)))
    print("KERNEL_OK")
</pallas_src>

<mosaic_0001>
module attributes {stable_mosaic.version = 11 : i64} {
  func.func @_embed_kernel(%arg0: i32, %arg1: memref<1x16x48xf32, #tpu.memory_space<vmem>>, %arg2: memref<48x32xbf16, #tpu.memory_space<vmem>>, %arg3: memref<1x32xf32, #tpu.memory_space<vmem>>, %arg4: memref<1x32xf32, #tpu.memory_space<vmem>>, %arg5: memref<17x32xf32, #tpu.memory_space<vmem>>, %arg6: memref<1x17x32xf32, #tpu.memory_space<vmem>>) attributes {dimension_semantics = [#tpu.dimension_semantics<parallel>], iteration_bounds = array<i64: 2>, scalar_prefetch = 0 : i64, scratch_operands = 0 : i64, tpu.core_type = #tpu.core_type<tc>, window_params = [{transform_indices = @transform_0, window_bounds = array<i64: 1, 16, 48>}, {pipeline_mode = #tpu.pipeline_mode<synchronous>, transform_indices = @transform_1, window_bounds = array<i64: 48, 32>}, {pipeline_mode = #tpu.pipeline_mode<synchronous>, transform_indices = @transform_2, window_bounds = array<i64: 1, 32>}, {pipeline_mode = #tpu.pipeline_mode<synchronous>, transform_indices = @transform_3, window_bounds = array<i64: 1, 32>}, {pipeline_mode = #tpu.pipeline_mode<synchronous>, transform_indices = @transform_4, window_bounds = array<i64: 17, 32>}, {transform_indices = @transform_5, window_bounds = array<i64: 1, 17, 32>}]} {
    %c0 = arith.constant 0 : index
    %c0_0 = arith.constant 0 : index
    %c0_1 = arith.constant 0 : index
    %0 = vector.load %arg1[%c0, %c0_0, %c0_1] : memref<1x16x48xf32, #tpu.memory_space<vmem>>, vector<1x16x48xf32>
    %1 = vector.shape_cast %0 : vector<1x16x48xf32> to vector<16x48xf32>
    %2 = arith.truncf %1 : vector<16x48xf32> to vector<16x48xbf16>
    %c0_2 = arith.constant 0 : index
    %c0_3 = arith.constant 0 : index
    %3 = vector.load %arg2[%c0_2, %c0_3] : memref<48x32xbf16, #tpu.memory_space<vmem>>, vector<48x32xbf16>
    %cst = arith.constant dense<0.000000e+00> : vector<16x32xf32>
    %4 = tpu.matmul %2, %3, %cst {dimension_numbers = #tpu.dot_dimension_numbers<[1], [0], [0], [1], [0, 0, 1, 1], [], []>} : vector<16x48xbf16>, vector<48x32xbf16>, vector<16x32xf32> -> vector<16x32xf32>
    %c0_4 = arith.constant 0 : index
    %c0_5 = arith.constant 0 : index
    %5 = vector.load %arg3[%c0_4, %c0_5] : memref<1x32xf32, #tpu.memory_space<vmem>>, vector<1x32xf32>
    %6 = vector.broadcast %5 : vector<1x32xf32> to vector<16x32xf32>
    %7 = arith.addf %4, %6 : vector<16x32xf32>
    %c0_6 = arith.constant 0 : index
    %c0_7 = arith.constant 0 : index
    %8 = vector.load %arg4[%c0_6, %c0_7] : memref<1x32xf32, #tpu.memory_space<vmem>>, vector<1x32xf32>
    %9 = tpu.concatenate %8, %7 in 0 : vector<1x32xf32>, vector<16x32xf32> -> vector<17x32xf32>
    %c0_8 = arith.constant 0 : index
    %c0_9 = arith.constant 0 : index
    %10 = vector.load %arg5[%c0_8, %c0_9] : memref<17x32xf32, #tpu.memory_space<vmem>>, vector<17x32xf32>
    %11 = arith.addf %9, %10 : vector<17x32xf32>
    %c0_10 = arith.constant 0 : index
    %c0_11 = arith.constant 0 : index
    %c0_12 = arith.constant 0 : index
    %12 = vector.load %arg6[%c0_10, %c0_11, %c0_12] : memref<1x17x32xf32, #tpu.memory_space<vmem>>, vector<1x17x32xf32>
    %13 = vector.shape_cast %12 : vector<1x17x32xf32> to vector<17x32xf32>
    %14 = vector.shape_cast %11 : vector<17x32xf32> to vector<1x17x32xf32>
    tpu.vector_store %arg6[%c0_10, %c0_11, %c0_12], %14 {strides = array<i32>} : memref<1x17x32xf32, #tpu.memory_space<vmem>>, vector<1x17x32xf32>,
    return
  }
  func.func @transform_0(%arg0: i32) -> (i32, i32, i32) {
    %c0_i32 = arith.constant 0 : i32
    %c0_i32_0 = arith.constant 0 : i32
    %c0_i32_1 = arith.constant 0 : i32
    return %arg0, %c0_i32, %c0_i32_0 : i32, i32, i32
  }
  func.func @transform_1(%arg0: i32) -> (i32, i32) {
    %c0_i32 = arith.constant 0 : i32
    %c0_i32_0 = arith.constant 0 : i32
    %c0_i32_1 = arith.constant 0 : i32
    return %c0_i32, %c0_i32_0 : i32, i32
  }
  func.func @transform_2(%arg0: i32) -> (i32, i32) {
    %c0_i32 = arith.constant 0 : i32
    %c0_i32_0 = arith.constant 0 : i32
    %c0_i32_1 = arith.constant 0 : i32
    return %c0_i32, %c0_i32_0 : i32, i32
  }
  func.func @transform_3(%arg0: i32) -> (i32, i32) {
    %c0_i32 = arith.constant 0 : i32
    %c0_i32_0 = arith.constant 0 : i32
    %c0_i32_1 = arith.constant 0 : i32
    return %c0_i32, %c0_i32_0 : i32, i32
  }
  func.func @transform_4(%arg0: i32) -> (i32, i32) {
    %c0_i32 = arith.constant 0 : i32
    %c0_i32_0 = arith.constant 0 : i32
    %c0_i32_1 = arith.constant 0 : i32
    return %c0_i32, %c0_i32_0 : i32, i32
  }
  func.func @transform_5(%arg0: i32) -> (i32, i32, i32) {
    %c0_i32 = arith.constant 0 : i32
    %c0_i32_0 = arith.constant 0 : i32
    %c0_i32_1 = arith.constant 0 : i32
    return %arg0, %c0_i32, %c0_i32_0 : i32, i32, i32
  }
}

module attributes {stable_mosaic.version = 11 : i64} {
  func.func @_head_kernel(%arg0: memref<2x17x32xf32, #tpu.memory_space<vmem>>, %arg1: memref<1x32xf32, #tpu.memory_space<vmem>>, %arg2: memref<1x32xf32, #tpu.memory_space<vmem>>, %arg3: memref<32x10xbf16, #tpu.memory_space<vmem>>, %arg4: memref<1x10xf32, #tpu.memory_space<vmem>>, %arg5: memref<2x10xf32, #tpu.memory_space<vmem>>) attributes {dimension_semantics = [], scalar_prefetch = 0 : i64, scratch_operands = 0 : i64, tpu.core_type = #tpu.core_type<tc>} {
    %c0 = arith.constant 0 : index
    %c0_0 = arith.constant 0 : index
    %c0_1 = arith.constant 0 : index
    %0 = vector.load %arg0[%c0, %c0_0, %c0_1] : memref<2x17x32xf32, #tpu.memory_space<vmem>>, vector<2x17x32xf32>
    %1 = vector.extract_strided_slice %0 {offsets = [0, 0, 0], sizes = [2, 1, 32], strides = [1, 1, 1]} : vector<2x17x32xf32> to vector<2x1x32xf32>
    %2 = vector.shape_cast %1 : vector<2x1x32xf32> to vector<2x32xf32>
    %c0_2 = arith.constant 0 : index
    %c0_3 = arith.constant 0 : index
    %3 = vector.load %arg1[%c0_2, %c0_3] : memref<1x32xf32, #tpu.memory_space<vmem>>, vector<1x32xf32>
    %c0_4 = arith.constant 0 : index
    %c0_5 = arith.constant 0 : index
    %4 = vector.load %arg2[%c0_4, %c0_5] : memref<1x32xf32, #tpu.memory_space<vmem>>, vector<1x32xf32>
    %cst = arith.constant dense<0.000000e+00> : vector<2xf32>
    %5 = vector.multi_reduction <add>, %2, %cst [1] : vector<2x32xf32> to vector<2xf32>
    %6 = vector.shape_cast %5 : vector<2xf32> to vector<2x1xf32>
    %cst_6 = arith.constant 3.200000e+01 : f32
    %7 = vector.broadcast %cst_6 : f32 to vector<2x1xf32>
    %8 = arith.divf %6, %7 : vector<2x1xf32>
    %9 = vector.broadcast %8 : vector<2x1xf32> to vector<2x32xf32>
    %10 = arith.subf %2, %9 : vector<2x32xf32>
    %11 = arith.mulf %10, %10 : vector<2x32xf32>
    %cst_7 = arith.constant dense<0.000000e+00> : vector<2xf32>
    %12 = vector.multi_reduction <add>, %11, %cst_7 [1] : vector<2x32xf32> to vector<2xf32>
    %13 = vector.shape_cast %12 : vector<2xf32> to vector<2x1xf32>
    %cst_8 = arith.constant 3.200000e+01 : f32
    %14 = vector.broadcast %cst_8 : f32 to vector<2x1xf32>
    %15 = arith.divf %13, %14 : vector<2x1xf32>
    %16 = vector.broadcast %8 : vector<2x1xf32> to vector<2x32xf32>
    %17 = arith.subf %2, %16 : vector<2x32xf32>
    %cst_9 = arith.constant 9.99999997E-7 : f32
    %18 = vector.broadcast %cst_9 : f32 to vector<2x1xf32>
    %19 = arith.addf %15, %18 : vector<2x1xf32>
    %20 = math.rsqrt %19 : vector<2x1xf32>
    %21 = vector.broadcast %20 : vector<2x1xf32> to vector<2x32xf32>
    %22 = arith.mulf %17, %21 : vector<2x32xf32>
    %23 = vector.broadcast %3 : vector<1x32xf32> to vector<2x32xf32>
    %24 = arith.mulf %22, %23 : vector<2x32xf32>
    %25 = vector.broadcast %4 : vector<1x32xf32> to vector<2x32xf32>
    %26 = arith.addf %24, %25 : vector<2x32xf32>
    %27 = arith.truncf %26 : vector<2x32xf32> to vector<2x32xbf16>
    %c0_10 = arith.constant 0 : index
    %c0_11 = arith.constant 0 : index
    %28 = vector.load %arg3[%c0_10, %c0_11] : memref<32x10xbf16, #tpu.memory_space<vmem>>, vector<32x10xbf16>
    %cst_12 = arith.constant dense<0.000000e+00> : vector<2x10xf32>
    %29 = tpu.matmul %27, %28, %cst_12 {dimension_numbers = #tpu.dot_dimension_numbers<[1], [0], [0], [1], [0, 0, 1, 1], [], []>} : vector<2x32xbf16>, vector<32x10xbf16>, vector<2x10xf32> -> vector<2x10xf32>
    %c0_13 = arith.constant 0 : index
    %c0_14 = arith.constant 0 : index
    %30 = vector.load %arg4[%c0_13, %c0_14] : memref<1x10xf32, #tpu.memory_space<vmem>>, vector<1x10xf32>
    %31 = vector.broadcast %30 : vector<1x10xf32> to vector<2x10xf32>
    %32 = arith.addf %29, %31 : vector<2x10xf32>
    %c0_15 = arith.constant 0 : index
    %c0_16 = arith.constant 0 : index
    %33 = vector.load %arg5[%c0_15, %c0_16] : memref<2x10xf32, #tpu.memory_space<vmem>>, vector<2x10xf32>
    tpu.vector_store %arg5[%c0_15, %c0_16], %32 {strides = array<i32>} : memref<2x10xf32, #tpu.memory_space<vmem>>, vector<2x10xf32>,
    return
  }
}

module attributes {stable_mosaic.version = 11 : i64} {
  func.func @_block_kernel(%arg0: i32, %arg1: memref<1x17x32xf32, #tpu.memory_space<vmem>>, %arg2: memref<1x32xf32, #tpu.memory_space<vmem>>, %arg3: memref<1x32xf32, #tpu.memory_space<vmem>>, %arg4: memref<4x32x8xbf16, #tpu.memory_space<vmem>>, %arg5: memref<4x1x8xf32, #tpu.memory_space<vmem>>, %arg6: memref<4x32x8xbf16, #tpu.memory_space<vmem>>, %arg7: memref<4x1x8xf32, #tpu.memory_space<vmem>>, %arg8: memref<4x32x8xbf16, #tpu.memory_space<vmem>>, %arg9: memref<4x1x8xf32, #tpu.memory_space<vmem>>, %arg10: memref<4x8x32xbf16, #tpu.memory_space<vmem>>, %arg11: memref<1x32xf32, #tpu.memory_space<vmem>>, %arg12: memref<1x32xf32, #tpu.memory_space<vmem>>, %arg13: memref<32x16xbf16, #tpu.memory_space<vmem>>, %arg14: memref<1x16xf32, #tpu.memory_space<vmem>>, %arg15: memref<16x32xbf16, #tpu.memory_space<vmem>>, %arg16: memref<1x32xf32, #tpu.memory_space<vmem>>, %arg17: memref<1x32xf32, #tpu.memory_space<vmem>>, %arg18: memref<1x32xf32, #tpu.memory_space<vmem>>, %arg19: memref<32x128xbf16, #tpu.memory_space<vmem>>, %arg20: memref<1x128xf32, #tpu.memory_space<vmem>>, %arg21: memref<128x32xbf16, #tpu.memory_space<vmem>>, %arg22: memref<1x32xf32, #tpu.memory_space<vmem>>, %arg23: memref<1x32xf32, #tpu.memory_space<vmem>>, %arg24: memref<32x16xbf16, #tpu.memory_space<vmem>>, %arg25: memref<1x16xf32, #tpu.memory_space<vmem>>, %arg26: memref<16x32xbf16, #tpu.memory_space<vmem>>, %arg27: memref<1x32xf32, #tpu.memory_space<vmem>>, %arg28: memref<1x17x32xf32, #tpu.memory_space<vmem>>) attributes {dimension_semantics = [#tpu.dimension_semantics<parallel>], iteration_bounds = array<i64: 2>, scalar_prefetch = 0 : i64, scratch_operands = 0 : i64, tpu.core_type = #tpu.core_type<tc>, window_params = [{transform_indices = @transform_0, window_bounds = array<i64: 1, 17, 32>}, {pipeline_mode = #tpu.pipeline_mode<synchronous>, transform_indices = @transform_1, window_bounds = array<i64: 1, 32>}, {pipeline_mode = #tpu.pipeline_mode<synchronous>, transform_indices = @transform_2, window_bounds = array<i64: 1, 32>}, {pipeline_mode = #tpu.pipeline_mode<synchronous>, transform_indices = @transform_3, window_bounds = array<i64: 4, 32, 8>}, {pipeline_mode = #tpu.pipeline_mode<synchronous>, transform_indices = @transform_4, window_bounds = array<i64: 4, 1, 8>}, {pipeline_mode = #tpu.pipeline_mode<synchronous>, transform_indices = @transform_5, window_bounds = array<i64: 4, 32, 8>}, {pipeline_mode = #tpu.pipeline_mode<synchronous>, transform_indices = @transform_6, window_bounds = array<i64: 4, 1, 8>}, {pipeline_mode = #tpu.pipeline_mode<synchronous>, transform_indices = @transform_7, window_bounds = array<i64: 4, 32, 8>}, {pipeline_mode = #tpu.pipeline_mode<synchronous>, transform_indices = @transform_8, window_bounds = array<i64: 4, 1, 8>}, {pipeline_mode = #tpu.pipeline_mode<synchronous>, transform_indices = @transform_9, window_bounds = array<i64: 4, 8, 32>}, {pipeline_mode = #tpu.pipeline_mode<synchronous>, transform_indices = @transform_10, window_bounds = array<i64: 1, 32>}, {pipeline_mode = #tpu.pipeline_mode<synchronous>, transform_indices = @transform_11, window_bounds = array<i64: 1, 32>}, {pipeline_mode = #tpu.pipeline_mode<synchronous>, transform_indices = @transform_12, window_bounds = array<i64: 32, 16>}, {pipeline_mode = #tpu.pipeline_mode<synchronous>, transform_indices = @transform_13, window_bounds = array<i64: 1, 16>}, {pipeline_mode = #tpu.pipeline_mode<synchronous>, transform_indices = @transform_14, window_bounds = array<i64: 16, 32>}, {pipeline_mode = #tpu.pipeline_mode<synchronous>, transform_indices = @transform_15, window_bounds = array<i64: 1, 32>}, {pipeline_mode = #tpu.pipeline_mode<synchronous>, transform_indices = @transform_16, window_bounds = array<i64: 1, 32>}, {pipeline_mode = #tpu.pipeline_mode<synchronous>, transform_indices = @transform_17, window_bounds = array<i64: 1, 32>}, {pipeline_mode = #tpu.pipeline_mode<synchronous>, transform_indices = @transform_18, window_bounds = array<i64: 32, 128>}, {pipeline_mode = #tpu.pipeline_mode<synchronous>, transform_indices = @transform_19, window_bounds = array<i64: 1, 128>}, {pipeline_mode = #tpu.pipeline_mode<synchronous>, transform_indices = @transform_20, window_bounds = array<i64: 128, 32>}, {pipeline_mode = #tpu.pipeline_mode<synchronous>, transform_indices = @transform_21, window_bounds = array<i64: 1, 32>}, {pipeline_mode = #tpu.pipeline_mode<synchronous>, transform_indices = @transform_22, window_bounds = array<i64: 1, 32>}, {pipeline_mode = #tpu.pipeline_mode<synchronous>, transform_indices = @transform_23, window_bounds = array<i64: 32, 16>}, {pipeline_mode = #tpu.pipeline_mode<synchronous>, transform_indices = @transform_24, window_bounds = array<i64: 1, 16>}, {pipeline_mode = #tpu.pipeline_mode<synchronous>, transform_indices = @transform_25, window_bounds = array<i64: 16, 32>}, {pipeline_mode = #tpu.pipeline_mode<synchronous>, transform_indices = @transform_26, window_bounds = array<i64: 1, 32>}, {transform_indices = @transform_27, window_bounds = array<i64: 1, 17, 32>}]} {
    %c0 = arith.constant 0 : index
    %c0_0 = arith.constant 0 : index
    %c0_1 = arith.constant 0 : index
    %0 = vector.load %arg1[%c0, %c0_0, %c0_1] : memref<1x17x32xf32, #tpu.memory_space<vmem>>, vector<1x17x32xf32>
    %1 = vector.shape_cast %0 : vector<1x17x32xf32> to vector<17x32xf32>
    %c0_2 = arith.constant 0 : index
    %c0_3 = arith.constant 0 : index
    %2 = vector.load %arg2[%c0_2, %c0_3] : memref<1x32xf32, #tpu.memory_space<vmem>>, vector<1x32xf32>
    %c0_4 = arith.constant 0 : index
    %c0_5 = arith.constant 0 : index
    %3 = vector.load %arg3[%c0_4, %c0_5] : memref<1x32xf32, #tpu.memory_space<vmem>>, vector<1x32xf32>
    %cst = arith.constant dense<0.000000e+00> : vector<17xf32>
    %4 = vector.multi_reduction <add>, %1, %cst [1] : vector<17x32xf32> to vector<17xf32>
    %5 = vector.shape_cast %4 : vector<17xf32> to vector<17x1xf32>
    %cst_6 = arith.constant 3.200000e+01 : f32
    %6 = vector.broadcast %cst_6 : f32 to vector<17x1xf32>
    %7 = arith.divf %5, %6 : vector<17x1xf32>
    %8 = vector.broadcast %7 : vector<17x1xf32> to vector<17x32xf32>
    %9 = arith.subf %1, %8 : vector<17x32xf32>
    %10 = arith.mulf %9, %9 : vector<17x32xf32>
    %cst_7 = arith.constant dense<0.000000e+00> : vector<17xf32>
    %11 = vector.multi_reduction <add>, %10, %cst_7 [1] : vector<17x32xf32> to vector<17xf32>
    %12 = vector.shape_cast %11 : vector<17xf32> to vector<17x1xf32>
    %cst_8 = arith.constant 3.200000e+01 : f32
    %13 = vector.broadcast %cst_8 : f32 to vector<17x1xf32>
    %14 = arith.divf %12, %13 : vector<17x1xf32>
    %15 = vector.broadcast %7 : vector<17x1xf32> to vector<17x32xf32>
    %16 = arith.subf %1, %15 : vector<17x32xf32>
    %cst_9 = arith.constant 9.99999997E-7 : f32
    %17 = vector.broadcast %cst_9 : f32 to vector<17x1xf32>
    %18 = arith.addf %14, %17 : vector<17x1xf32>
    %19 = math.rsqrt %18 : vector<17x1xf32>
    %20 = vector.broadcast %19 : vector<17x1xf32> to vector<17x32xf32>
    %21 = arith.mulf %16, %20 : vector<17x32xf32>
    %22 = vector.broadcast %2 : vector<1x32xf32> to vector<17x32xf32>
    %23 = arith.mulf %21, %22 : vector<17x32xf32>
    %24 = vector.broadcast %3 : vector<1x32xf32> to vector<17x32xf32>
    %25 = arith.addf %23, %24 : vector<17x32xf32>
    %26 = arith.truncf %25 : vector<17x32xf32> to vector<17x32xbf16>
    %cst_10 = arith.constant 0.000000e+00 : f32
    %27 = vector.broadcast %cst_10 : f32 to vector<17x32xf32>
    %c0_11 = arith.constant 0 : index
    %c0_12 = arith.constant 0 : index
    %c0_13 = arith.constant 0 : index
    %28 = vector.load %arg4[%c0_11, %c0_12, %c0_13] : memref<4x32x8xbf16, #tpu.memory_space<vmem>>, vector<1x32x8xbf16>
    %29 = vector.shape_cast %28 : vector<1x32x8xbf16> to vector<32x8xbf16>
    %cst_14 = arith.constant dense<0.000000e+00> : vector<17x8xf32>
    %30 = tpu.matmul %26, %29, %cst_14 {dimension_numbers = #tpu.dot_dimension_numbers<[1], [0], [0], [1], [0, 0, 1, 1], [], []>} : vector<17x32xbf16>, vector<32x8xbf16>, vector<17x8xf32> -> vector<17x8xf32>
    %c0_15 = arith.constant 0 : index
    %c0_16 = arith.constant 0 : index
    %c0_17 = arith.constant 0 : index
    %31 = vector.load %arg5[%c0_15, %c0_16, %c0_17] : memref<4x1x8xf32, #tpu.memory_space<vmem>>, vector<1x1x8xf32>
    %32 = vector.shape_cast %31 : vector<1x1x8xf32> to vector<1x8xf32>
    %33 = vector.broadcast %32 : vector<1x8xf32> to vector<17x8xf32>
    %34 = arith.addf %30, %33 : vector<17x8xf32>
    %c0_18 = arith.constant 0 : index
    %c0_19 = arith.constant 0 : index
    %c0_20 = arith.constant 0 : index
    %35 = vector.load %arg6[%c0_18, %c0_19, %c0_20] : memref<4x32x8xbf16, #tpu.memory_space<vmem>>, vector<1x32x8xbf16>
    %36 = vector.shape_cast %35 : vector<1x32x8xbf16> to vector<32x8xbf16>
    %cst_21 = arith.constant dense<0.000000e+00> : vector<17x8xf32>
    %37 = tpu.matmul %26, %36, %cst_21 {dimension_numbers = #tpu.dot_dimension_numbers<[1], [0], [0], [1], [0, 0, 1, 1], [], []>} : vector<17x32xbf16>, vector<32x8xbf16>, vector<17x8xf32> -> vector<17x8xf32>
    %c0_22 = arith.constant 0 : index
    %c0_23 = arith.constant 0 : index
    %c0_24 = arith.constant 0 : index
    %38 = vector.load %arg7[%c0_22, %c0_23, %c0_24] : memref<4x1x8xf32, #tpu.memory_space<vmem>>, vector<1x1x8xf32>
    %39 = vector.shape_cast %38 : vector<1x1x8xf32> to vector<1x8xf32>
    %40 = vector.broadcast %39 : vector<1x8xf32> to vector<17x8xf32>
    %41 = arith.addf %37, %40 : vector<17x8xf32>
    %c0_25 = arith.constant 0 : index
    %c0_26 = arith.constant 0 : index
    %c0_27 = arith.constant 0 : index
    %42 = vector.load %arg8[%c0_25, %c0_26, %c0_27] : memref<4x32x8xbf16, #tpu.memory_space<vmem>>, vector<1x32x8xbf16>
    %43 = vector.shape_cast %42 : vector<1x32x8xbf16> to vector<32x8xbf16>
    %cst_28 = arith.constant dense<0.000000e+00> : vector<17x8xf32>
    %44 = tpu.matmul %26, %43, %cst_28 {dimension_numbers = #tpu.dot_dimension_numbers<[1], [0], [0], [1], [0, 0, 1, 1], [], []>} : vector<17x32xbf16>, vector<32x8xbf16>, vector<17x8xf32> -> vector<17x8xf32>
    %c0_29 = arith.constant 0 : index
    %c0_30 = arith.constant 0 : index
    %c0_31 = arith.constant 0 : index
    %45 = vector.load %arg9[%c0_29, %c0_30, %c0_31] : memref<4x1x8xf32, #tpu.memory_space<vmem>>, vector<1x1x8xf32>
    %46 = vector.shape_cast %45 : vector<1x1x8xf32> to vector<1x8xf32>
    %47 = vector.broadcast %46 : vector<1x8xf32> to vector<17x8xf32>
    %48 = arith.addf %44, %47 : vector<17x8xf32>
    %49 = arith.truncf %34 : vector<17x8xf32> to vector<17x8xbf16>
    %50 = arith.truncf %41 : vector<17x8xf32> to vector<17x8xbf16>
    %cst_32 = arith.constant dense<0.000000e+00> : vector<17x17xf32>
    %51 = tpu.matmul %49, %50, %cst_32 {dimension_numbers = #tpu.dot_dimension_numbers<[1], [1], [0], [0], [0, 0, 1, 0], [], []>} : vector<17x8xbf16>, vector<17x8xbf16>, vector<17x17xf32> -> vector<17x17xf32>
    %cst_33 = arith.constant 0.353553385 : f32
    %52 = vector.broadcast %cst_33 : f32 to vector<17x17xf32>
    %53 = arith.mulf %51, %52 : vector<17x17xf32>
    %cst_34 = arith.constant dense<0xFF800000> : vector<17xf32>
    %54 = vector.multi_reduction <maximumf>, %53, %cst_34 [1] : vector<17x17xf32> to vector<17xf32>
    %55 = vector.shape_cast %54 : vector<17xf32> to vector<17x1xf32>
    %56 = vector.broadcast %55 : vector<17x1xf32> to vector<17x17xf32>
    %57 = arith.subf %53, %56 : vector<17x17xf32>
    %58 = math.exp %57 : vector<17x17xf32>
    %cst_35 = arith.constant dense<0.000000e+00> : vector<17xf32>
    %59 = vector.multi_reduction <add>, %58, %cst_35 [1] : vector<17x17xf32> to vector<17xf32>
    %60 = vector.shape_cast %59 : vector<17xf32> to vector<17x1xf32>
    %61 = tpu.reciprocal %60 {approx = true} : vector<17x1xf32> -> vector<17x1xf32>
    %62 = vector.broadcast %61 : vector<17x1xf32> to vector<17x17xf32>
    %63 = arith.mulf %58, %62 : vector<17x17xf32>
    %64 = arith.truncf %63 : vector<17x17xf32> to vector<17x17xbf16>
    %65 = arith.truncf %48 : vector<17x8xf32> to vector<17x8xbf16>
    %cst_36 = arith.constant dense<0.000000e+00> : vector<17x8xf32>
    %66 = tpu.matmul %64, %65, %cst_36 {dimension_numbers = #tpu.dot_dimension_numbers<[1], [0], [0], [1], [0, 0, 1, 1], [], []>} : vector<17x17xbf16>, vector<17x8xbf16>, vector<17x8xf32> -> vector<17x8xf32>
    %67 = arith.truncf %66 : vector<17x8xf32> to vector<17x8xbf16>
    %c0_37 = arith.constant 0 : index
    %c0_38 = arith.constant 0 : index
    %c0_39 = arith.constant 0 : index
    %68 = vector.load %arg10[%c0_37, %c0_38, %c0_39] : memref<4x8x32xbf16, #tpu.memory_space<vmem>>, vector<1x8x32xbf16>
    %69 = vector.shape_cast %68 : vector<1x8x32xbf16> to vector<8x32xbf16>
    %cst_40 = arith.constant dense<0.000000e+00> : vector<17x32xf32>
    %70 = tpu.matmul %67, %69, %cst_40 {dimension_numbers = #tpu.dot_dimension_numbers<[1], [0], [0], [1], [0, 0, 1, 1], [], []>} : vector<17x8xbf16>, vector<8x32xbf16>, vector<17x32xf32> -> vector<17x32xf32>
    %71 = arith.addf %27, %70 : vector<17x32xf32>
    %c1 = arith.constant 1 : index
    %c0_41 = arith.constant 0 : index
    %c0_42 = arith.constant 0 : index
    %72 = vector.load %arg4[%c1, %c0_41, %c0_42] : memref<4x32x8xbf16, #tpu.memory_space<vmem>>, vector<1x32x8xbf16>
    %73 = vector.shape_cast %72 : vector<1x32x8xbf16> to vector<32x8xbf16>
    %cst_43 = arith.constant dense<0.000000e+00> : vector<17x8xf32>
    %74 = tpu.matmul %26, %73, %cst_43 {dimension_numbers = #tpu.dot_dimension_numbers<[1], [0], [0], [1], [0, 0, 1, 1], [], []>} : vector<17x32xbf16>, vector<32x8xbf16>, vector<17x8xf32> -> vector<17x8xf32>
    %c1_44 = arith.constant 1 : index
    %c0_45 = arith.constant 0 : index
    %c0_46 = arith.constant 0 : index
    %75 = vector.load %arg5[%c1_44, %c0_45, %c0_46] : memref<4x1x8xf32, #tpu.memory_space<vmem>>, vector<1x1x8xf32>
    %76 = vector.shape_cast %75 : vector<1x1x8xf32> to vector<1x8xf32>
    %77 = vector.broadcast %76 : vector<1x8xf32> to vector<17x8xf32>
    %78 = arith.addf %74, %77 : vector<17x8xf32>
    %c1_47 = arith.constant 1 : index
    %c0_48 = arith.constant 0 : index
    %c0_49 = arith.constant 0 : index
    %79 = vector.load %arg6[%c1_47, %c0_48, %c0_49] : memref<4x32x8xbf16, #tpu.memory_space<vmem>>, vector<1x32x8xbf16>
    %80 = vector.shape_cast %79 : vector<1x32x8xbf16> to vector<32x8xbf16>
    %cst_50 = arith.constant dense<0.000000e+00> : vector<17x8xf32>
    %81 = tpu.matmul %26, %80, %cst_50 {dimension_numbers = #tpu.dot_dimension_numbers<[1], [0], [0], [1], [0, 0, 1, 1], [], []>} : vector<17x32xbf16>, vector<32x8xbf16>, vector<17x8xf32> -> vector<17x8xf32>
    %c1_51 = arith.constant 1 : index
    %c0_52 = arith.constant 0 : index
    %c0_53 = arith.constant 0 : index
    %82 = vector.load %arg7[%c1_51, %c0_52, %c0_53] : memref<4x1x8xf32, #tpu.memory_space<vmem>>, vector<1x1x8xf32>
    %83 = vector.shape_cast %82 : vector<1x1x8xf32> to vector<1x8xf32>
    %84 = vector.broadcast %83 : vector<1x8xf32> to vector<17x8xf32>
    %85 = arith.addf %81, %84 : vector<17x8xf32>
    %c1_54 = arith.constant 1 : index
    %c0_55 = arith.constant 0 : index
    %c0_56 = arith.constant 0 : index
    %86 = vector.load %arg8[%c1_54, %c0_55, %c0_56] : memref<4x32x8xbf16, #tpu.memory_space<vmem>>, vector<1x32x8xbf16>
    %87 = vector.shape_cast %86 : vector<1x32x8xbf16> to vector<32x8xbf16>
    %cst_57 = arith.constant dense<0.000000e+00> : vector<17x8xf32>
    %88 = tpu.matmul %26, %87, %cst_57 {dimension_numbers = #tpu.dot_dimension_numbers<[1], [0], [0], [1], [0, 0, 1, 1], [], []>} : vector<17x32xbf16>, vector<32x8xbf16>, vector<17x8xf32> -> vector<17x8xf32>
    %c1_58 = arith.constant 1 : index
    %c0_59 = arith.constant 0 : index
    %c0_60 = arith.constant 0 : index
    %89 = vector.load %arg9[%c1_58, %c0_59, %c0_60] : memref<4x1x8xf32, #tpu.memory_space<vmem>>, vector<1x1x8xf32>
    %90 = vector.shape_cast %89 : vector<1x1x8xf32> to vector<1x8xf32>
    %91 = vector.broadcast %90 : vector<1x8xf32> to vector<17x8xf32>
    %92 = arith.addf %88, %91 : vector<17x8xf32>
    %93 = arith.truncf %78 : vector<17x8xf32> to vector<17x8xbf16>
    %94 = arith.truncf %85 : vector<17x8xf32> to vector<17x8xbf16>
    %cst_61 = arith.constant dense<0.000000e+00> : vector<17x17xf32>
    %95 = tpu.matmul %93, %94, %cst_61 {dimension_numbers = #tpu.dot_dimension_numbers<[1], [1], [0], [0], [0, 0, 1, 0], [], []>} : vector<17x8xbf16>, vector<17x8xbf16>, vector<17x17xf32> -> vector<17x17xf32>
    %cst_62 = arith.constant 0.353553385 : f32
    %96 = vector.broadcast %cst_62 : f32 to vector<17x17xf32>
    %97 = arith.mulf %95, %96 : vector<17x17xf32>
    %cst_63 = arith.constant dense<0xFF800000> : vector<17xf32>
    %98 = vector.multi_reduction <maximumf>, %97, %cst_63 [1] : vector<17x17xf32> to vector<17xf32>
    %99 = vector.shape_cast %98 : vector<17xf32> to vector<17x1xf32>
    %100 = vector.broadcast %99 : vector<17x1xf32> to vector<17x17xf32>
    %101 = arith.subf %97, %100 : vector<17x17xf32>
    %102 = math.exp %101 : vector<17x17xf32>
    %cst_64 = arith.constant dense<0.000000e+00> : vector<17xf32>
    %103 = vector.multi_reduction <add>, %102, %cst_64 [1] : vector<17x17xf32> to vector<17xf32>
    %104 = vector.shape_cast %103 : vector<17xf32> to vector<17x1xf32>
    %105 = tpu.reciprocal %104 {approx = true} : vector<17x1xf32> -> vector<17x1xf32>
    %106 = vector.broadcast %105 : vector<17x1xf32> to vector<17x17xf32>
    %107 = arith.mulf %102, %106 : vector<17x17xf32>
    %108 = arith.truncf %107 : vector<17x17xf32> to vector<17x17xbf16>
    %109 = arith.truncf %92 : vector<17x8xf32> to vector<17x8xbf16>
    %cst_65 = arith.constant dense<0.000000e+00> : vector<17x8xf32>
    %110 = tpu.matmul %108, %109, %cst_65 {dimension_numbers = #tpu.dot_dimension_numbers<[1], [0], [0], [1], [0, 0, 1, 1], [], []>} : vector<17x17xbf16>, vector<17x8xbf16>, vector<17x8xf32> -> vector<17x8xf32>
    %111 = arith.truncf %110 : vector<17x8xf32> to vector<17x8xbf16>
    %c1_66 = arith.constant 1 : index
    %c0_67 = arith.constant 0 : index
    %c0_68 = arith.constant 0 : index
    %112 = vector.load %arg10[%c1_66, %c0_67, %c0_68] : memref<4x8x32xbf16, #tpu.memory_space<vmem>>, vector<1x8x32xbf16>
    %113 = vector.shape_cast %112 : vector<1x8x32xbf16> to vector<8x32xbf16>
    %cst_69 = arith.constant dense<0.000000e+00> : vector<17x32xf32>
    %114 = tpu.matmul %111, %113, %cst_69 {dimension_numbers = #tpu.dot_dimension_numbers<[1], [0], [0], [1], [0, 0, 1, 1], [], []>} : vector<17x8xbf16>, vector<8x32xbf16>, vector<17x32xf32> -> vector<17x32xf32>
    %115 = arith.addf %71, %114 : vector<17x32xf32>
    %c2 = arith.constant 2 : index
    %c0_70 = arith.constant 0 : index
    %c0_71 = arith.constant 0 : index
    %116 = vector.load %arg4[%c2, %c0_70, %c0_71] : memref<4x32x8xbf16, #tpu.memory_space<vmem>>, vector<1x32x8xbf16>
    %117 = vector.shape_cast %116 : vector<1x32x8xbf16> to vector<32x8xbf16>
    %cst_72 = arith.constant dense<0.000000e+00> : vector<17x8xf32>
    %118 = tpu.matmul %26, %117, %cst_72 {dimension_numbers = #tpu.dot_dimension_numbers<[1], [0], [0], [1], [0, 0, 1, 1], [], []>} : vector<17x32xbf16>, vector<32x8xbf16>, vector<17x8xf32> -> vector<17x8xf32>
    %c2_73 = arith.constant 2 : index
    %c0_74 = arith.constant 0 : index
    %c0_75 = arith.constant 0 : index
    %119 = vector.load %arg5[%c2_73, %c0_74, %c0_75] : memref<4x1x8xf32, #tpu.memory_space<vmem>>, vector<1x1x8xf32>
    %120 = vector.shape_cast %119 : vector<1x1x8xf32> to vector<1x8xf32>
    %121 = vector.broadcast %120 : vector<1x8xf32> to vector<17x8xf32>
    %122 = arith.addf %118, %121 : vector<17x8xf32>
    %c2_76 = arith.constant 2 : index
    %c0_77 = arith.constant 0 : index
    %c0_78 = arith.constant 0 : index
    %123 = vector.load %arg6[%c2_76, %c0_77, %c0_78] : memref<4x32x8xbf16, #tpu.memory_space<vmem>>, vector<1x32x8xbf16>
    %124 = vector.shape_cast %123 : vector<1x32x8xbf16> to vector<32x8xbf16>
    %cst_79 = arith.constant dense<0.000000e+00> : vector<17x8xf32>
    %125 = tpu.matmul %26, %124, %cst_79 {dimension_numbers = #tpu.dot_dimension_numbers<[1], [0], [0], [1], [0, 0, 1, 1], [], []>} : vector<17x32xbf16>, vector<32x8xbf16>, vector<17x8xf32> -> vector<17x8xf32>
    %c2_80 = arith.constant 2 : index
    %c0_81 = arith.constant 0 : index
    %c0_82 = arith.constant 0 : index
    %126 = vector.load %arg7[%c2_80, %c0_81, %c0_82] : memref<4x1x8xf32, #tpu.memory_space<vmem>>, vector<1x1x8xf32>
    %127 = vector.shape_cast %126 : vector<1x1x8xf32> to vector<1x8xf32>
    %128 = vector.broadcast %127 : vector<1x8xf32> to vector<17x8xf32>
    %129 = arith.addf %125, %128 : vector<17x8xf32>
    %c2_83 = arith.constant 2 : index
    %c0_84 = arith.constant 0 : index
    %c0_85 = arith.constant 0 : index
    %130 = vector.load %arg8[%c2_83, %c0_84, %c0_85] : memref<4x32x8xbf16, #tpu.memory_space<vmem>>, vector<1x32x8xbf16>
    %131 = vector.shape_cast %130 : vector<1x32x8xbf16> to vector<32x8xbf16>
    %cst_86 = arith.constant dense<0.000000e+00> : vector<17x8xf32>
    %132 = tpu.matmul %26, %131, %cst_86 {dimension_numbers = #tpu.dot_dimension_numbers<[1], [0], [0], [1], [0, 0, 1, 1], [], []>} : vector<17x32xbf16>, vector<32x8xbf16>, vector<17x8xf32> -> vector<17x8xf32>
    %c2_87 = arith.constant 2 : index
    %c0_88 = arith.constant 0 : index
    %c0_89 = arith.constant 0 : index
    %133 = vector.load %arg9[%c2_87, %c0_88, %c0_89] : memref<4x1x8xf32, #tpu.memory_space<vmem>>, vector<1x1x8xf32>
    %134 = vector.shape_cast %133 : vector<1x1x8xf32> to vector<1x8xf32>
    %135 = vector.broadcast %134 : vector<1x8xf32> to vector<17x8xf32>
    %136 = arith.addf %132, %135 : vector<17x8xf32>
    %137 = arith.truncf %122 : vector<17x8xf32> to vector<17x8xbf16>
    %138 = arith.truncf %129 : vector<17x8xf32> to vector<17x8xbf16>
    %cst_90 = arith.constant dense<0.000000e+00> : vector<17x17xf32>
    %139 = tpu.matmul %137, %138, %cst_90 {dimension_numbers = #tpu.dot_dimension_numbers<[1], [1], [0], [0], [0, 0, 1, 0], [], []>} : vector<17x8xbf16>, vector<17x8xbf16>, vector<17x17xf32> -> vector<17x17xf32>
    %cst_91 = arith.constant 0.353553385 : f32
    %140 = vector.broadcast %cst_91 : f32 to vector<17x17xf32>
    %141 = arith.mulf %139, %140 : vector<17x17xf32>
    %cst_92 = arith.constant dense<0xFF800000> : vector<17xf32>
    %142 = vector.multi_reduction <maximumf>, %141, %cst_92 [1] : vector<17x17xf32> to vector<17xf32>
    %143 = vector.shape_cast %142 : vector<17xf32> to vector<17x1xf32>
    %144 = vector.broadcast %143 : vector<17x1xf32> to vector<17x17xf32>
    %145 = arith.subf %141, %144 : vector<17x17xf32>
    %146 = math.exp %145 : vector<17x17xf32>
    %cst_93 = arith.constant dense<0.000000e+00> : vector<17xf32>
    %147 = vector.multi_reduction <add>, %146, %cst_93 [1] : vector<17x17xf32> to vector<17xf32>
    %148 = vector.shape_cast %147 : vector<17xf32> to vector<17x1xf32>
    %149 = tpu.reciprocal %148 {approx = true} : vector<17x1xf32> -> vector<17x1xf32>
    %150 = vector.broadcast %149 : vector<17x1xf32> to vector<17x17xf32>
    %151 = arith.mulf %146, %150 : vector<17x17xf32>
    %152 = arith.truncf %151 : vector<17x17xf32> to vector<17x17xbf16>
    %153 = arith.truncf %136 : vector<17x8xf32> to vector<17x8xbf16>
    %cst_94 = arith.constant dense<0.000000e+00> : vector<17x8xf32>
    %154 = tpu.matmul %152, %153, %cst_94 {dimension_numbers = #tpu.dot_dimension_numbers<[1], [0], [0], [1], [0, 0, 1, 1], [], []>} : vector<17x17xbf16>, vector<17x8xbf16>, vector<17x8xf32> -> vector<17x8xf32>
    %155 = arith.truncf %154 : vector<17x8xf32> to vector<17x8xbf16>
    %c2_95 = arith.constant 2 : index
    %c0_96 = arith.constant 0 : index
    %c0_97 = arith.constant 0 : index
    %156 = vector.load %arg10[%c2_95, %c0_96, %c0_97] : memref<4x8x32xbf16, #tpu.memory_space<vmem>>, vector<1x8x32xbf16>
    %157 = vector.shape_cast %156 : vector<1x8x32xbf16> to vector<8x32xbf16>
    %cst_98 = arith.constant dense<0.000000e+00> : vector<17x32xf32>
    %158 = tpu.matmul %155, %157, %cst_98 {dimension_numbers = #tpu.dot_dimension_numbers<[1], [0], [0], [1], [0, 0, 1, 1], [], []>} : vector<17x8xbf16>, vector<8x32xbf16>, vector<17x32xf32> -> vector<17x32xf32>
    %159 = arith.addf %115, %158 : vector<17x32xf32>
    %c3 = arith.constant 3 : index
    %c0_99 = arith.constant 0 : index
    %c0_100 = arith.constant 0 : index
    %160 = vector.load %arg4[%c3, %c0_99, %c0_100] : memref<4x32x8xbf16, #tpu.memory_space<vmem>>, vector<1x32x8xbf16>
    %161 = vector.shape_cast %160 : vector<1x32x8xbf16> to vector<32x8xbf16>
    %cst_101 = arith.constant dense<0.000000e+00> : vector<17x8xf32>
    %162 = tpu.matmul %26, %161, %cst_101 {dimension_numbers = #tpu.dot_dimension_numbers<[1], [0], [0], [1], [0, 0, 1, 1], [], []>} : vector<17x32xbf16>, vector<32x8xbf16>, vector<17x8xf32> -> vector<17x8xf32>
    %c3_102 = arith.constant 3 : index
    %c0_103 = arith.constant 0 : index
    %c0_104 = arith.constant 0 : index
    %163 = vector.load %arg5[%c3_102, %c0_103, %c0_104] : memref<4x1x8xf32, #tpu.memory_space<vmem>>, vector<1x1x8xf32>
    %164 = vector.shape_cast %163 : vector<1x1x8xf32> to vector<1x8xf32>
    %165 = vector.broadcast %164 : vector<1x8xf32> to vector<17x8xf32>
    %166 = arith.addf %162, %165 : vector<17x8xf32>
    %c3_105 = arith.constant 3 : index
    %c0_106 = arith.constant 0 : index
    %c0_107 = arith.constant 0 : index
    %167 = vector.load %arg6[%c3_105, %c0_106, %c0_107] : memref<4x32x8xbf16, #tpu.memory_space<vmem>>, vector<1x32x8xbf16>
    %168 = vector.shape_cast %167 : vector<1x32x8xbf16> to vector<32x8xbf16>
    %cst_108 = arith.constant dense<0.000000e+00> : vector<17x8xf32>
    %169 = tpu.matmul %26, %168, %cst_108 {dimension_numbers = #tpu.dot_dimension_numbers<[1], [0], [0], [1], [0, 0, 1, 1], [], []>} : vector<17x32xbf16>, vector<32x8xbf16>, vector<17x8xf32> -> vector<17x8xf32>
    %c3_109 = arith.constant 3 : index
    %c0_110 = arith.constant 0 : index
    %c0_111 = arith.constant 0 : index
    %170 = vector.load %arg7[%c3_109, %c0_110, %c0_111] : memref<4x1x8xf32, #tpu.memory_space<vmem>>, vector<1x1x8xf32>
    %171 = vector.shape_cast %170 : vector<1x1x8xf32> to vector<1x8xf32>
    %172 = vector.broadcast %171 : vector<1x8xf32> to vector<17x8xf32>
    %173 = arith.addf %169, %172 : vector<17x8xf32>
    %c3_112 = arith.constant 3 : index
    %c0_113 = arith.constant 0 : index
    %c0_114 = arith.constant 0 : index
    %174 = vector.load %arg8[%c3_112, %c0_113, %c0_114] : memref<4x32x8xbf16, #tpu.memory_space<vmem>>, vector<1x32x8xbf16>
    %175 = vector.shape_cast %174 : vector<1x32x8xbf16> to vector<32x8xbf16>
    %cst_115 = arith.constant dense<0.000000e+00> : vector<17x8xf32>
    %176 = tpu.matmul %26, %175, %cst_115 {dimension_numbers = #tpu.dot_dimension_numbers<[1], [0], [0], [1], [0, 0, 1, 1], [], []>} : vector<17x32xbf16>, vector<32x8xbf16>, vector<17x8xf32> -> vector<17x8xf32>
    %c3_116 = arith.constant 3 : index
    %c0_117 = arith.constant 0 : index
    %c0_118 = arith.constant 0 : index
    %177 = vector.load %arg9[%c3_116, %c0_117, %c0_118] : memref<4x1x8xf32, #tpu.memory_space<vmem>>, vector<1x1x8xf32>
    %178 = vector.shape_cast %177 : vector<1x1x8xf32> to vector<1x8xf32>
    %179 = vector.broadcast %178 : vector<1x8xf32> to vector<17x8xf32>
    %180 = arith.addf %176, %179 : vector<17x8xf32>
    %181 = arith.truncf %166 : vector<17x8xf32> to vector<17x8xbf16>
    %182 = arith.truncf %173 : vector<17x8xf32> to vector<17x8xbf16>
    %cst_119 = arith.constant dense<0.000000e+00> : vector<17x17xf32>
    %183 = tpu.matmul %181, %182, %cst_119 {dimension_numbers = #tpu.dot_dimension_numbers<[1], [1], [0], [0], [0, 0, 1, 0], [], []>} : vector<17x8xbf16>, vector<17x8xbf16>, vector<17x17xf32> -> vector<17x17xf32>
    %cst_120 = arith.constant 0.353553385 : f32
    %184 = vector.broadcast %cst_120 : f32 to vector<17x17xf32>
    %185 = arith.mulf %183, %184 : vector<17x17xf32>
    %cst_121 = arith.constant dense<0xFF800000> : vector<17xf32>
    %186 = vector.multi_reduction <maximumf>, %185, %cst_121 [1] : vector<17x17xf32> to vector<17xf32>
    %187 = vector.shape_cast %186 : vector<17xf32> to vector<17x1xf32>
    %188 = vector.broadcast %187 : vector<17x1xf32> to vector<17x17xf32>
    %189 = arith.subf %185, %188 : vector<17x17xf32>
    %190 = math.exp %189 : vector<17x17xf32>
    %cst_122 = arith.constant dense<0.000000e+00> : vector<17xf32>
    %191 = vector.multi_reduction <add>, %190, %cst_122 [1] : vector<17x17xf32> to vector<17xf32>
    %192 = vector.shape_cast %191 : vector<17xf32> to vector<17x1xf32>
    %193 = tpu.reciprocal %192 {approx = true} : vector<17x1xf32> -> vector<17x1xf32>
    %194 = vector.broadcast %193 : vector<17x1xf32> to vector<17x17xf32>
    %195 = arith.mulf %190, %194 : vector<17x17xf32>
    %196 = arith.truncf %195 : vector<17x17xf32> to vector<17x17xbf16>
    %197 = arith.truncf %180 : vector<17x8xf32> to vector<17x8xbf16>
    %cst_123 = arith.constant dense<0.000000e+00> : vector<17x8xf32>
    %198 = tpu.matmul %196, %197, %cst_123 {dimension_numbers = #tpu.dot_dimension_numbers<[1], [0], [0], [1], [0, 0, 1, 1], [], []>} : vector<17x17xbf16>, vector<17x8xbf16>, vector<17x8xf32> -> vector<17x8xf32>
    %199 = arith.truncf %198 : vector<17x8xf32> to vector<17x8xbf16>
    %c3_124 = arith.constant 3 : index
    %c0_125 = arith.constant 0 : index
    %c0_126 = arith.constant 0 : index
    %200 = vector.load %arg10[%c3_124, %c0_125, %c0_126] : memref<4x8x32xbf16, #tpu.memory_space<vmem>>, vector<1x8x32xbf16>
    %201 = vector.shape_cast %200 : vector<1x8x32xbf16> to vector<8x32xbf16>
    %cst_127 = arith.constant dense<0.000000e+00> : vector<17x32xf32>
    %202 = tpu.matmul %199, %201, %cst_127 {dimension_numbers = #tpu.dot_dimension_numbers<[1], [0], [0], [1], [0, 0, 1, 1], [], []>} : vector<17x8xbf16>, vector<8x32xbf16>, vector<17x32xf32> -> vector<17x32xf32>
    %203 = arith.addf %159, %202 : vector<17x32xf32>
    %c0_128 = arith.constant 0 : index
    %c0_129 = arith.constant 0 : index
    %204 = vector.load %arg11[%c0_128, %c0_129] : memref<1x32xf32, #tpu.memory_space<vmem>>, vector<1x32xf32>
    %205 = vector.broadcast %204 : vector<1x32xf32> to vector<17x32xf32>
    %206 = arith.addf %203, %205 : vector<17x32xf32>
    %207 = arith.truncf %206 : vector<17x32xf32> to vector<17x32xbf16>
    %c0_130 = arith.constant 0 : index
    %c0_131 = arith.constant 0 : index
    %208 = vector.load %arg13[%c0_130, %c0_131] : memref<32x16xbf16, #tpu.memory_space<vmem>>, vector<32x16xbf16>
    %cst_132 = arith.constant dense<0.000000e+00> : vector<17x16xf32>
    %209 = tpu.matmul %207, %208, %cst_132 {dimension_numbers = #tpu.dot_dimension_numbers<[1], [0], [0], [1], [0, 0, 1, 1], [], []>} : vector<17x32xbf16>, vector<32x16xbf16>, vector<17x16xf32> -> vector<17x16xf32>
    %c0_133 = arith.constant 0 : index
    %c0_134 = arith.constant 0 : index
    %210 = vector.load %arg14[%c0_133, %c0_134] : memref<1x16xf32, #tpu.memory_space<vmem>>, vector<1x16xf32>
    %211 = vector.broadcast %210 : vector<1x16xf32> to vector<17x16xf32>
    %212 = arith.addf %209, %211 : vector<17x16xf32>
    %cst_135 = arith.constant 5.000000e-01 : f32
    %213 = vector.broadcast %cst_135 : f32 to vector<17x16xf32>
    %214 = arith.mulf %213, %212 : vector<17x16xf32>
    %cst_136 = arith.constant 0.707106769 : f32
    %215 = vector.broadcast %cst_136 : f32 to vector<17x16xf32>
    %216 = arith.mulf %212, %215 : vector<17x16xf32>
    %217 = math.erf %216 : vector<17x16xf32>
    %cst_137 = arith.constant 1.000000e+00 : f32
    %218 = vector.broadcast %cst_137 : f32 to vector<17x16xf32>
    %219 = arith.addf %218, %217 : vector<17x16xf32>
    %220 = arith.mulf %214, %219 : vector<17x16xf32>
    %221 = arith.truncf %220 : vector<17x16xf32> to vector<17x16xbf16>
    %c0_138 = arith.constant 0 : index
    %c0_139 = arith.constant 0 : index
    %222 = vector.load %arg15[%c0_138, %c0_139] : memref<16x32xbf16, #tpu.memory_space<vmem>>, vector<16x32xbf16>
    %cst_140 = arith.constant dense<0.000000e+00> : vector<17x32xf32>
    %223 = tpu.matmul %221, %222, %cst_140 {dimension_numbers = #tpu.dot_dimension_numbers<[1], [0], [0], [1], [0, 0, 1, 1], [], []>} : vector<17x16xbf16>, vector<16x32xbf16>, vector<17x32xf32> -> vector<17x32xf32>
    %c0_141 = arith.constant 0 : index
    %c0_142 = arith.constant 0 : index
    %224 = vector.load %arg16[%c0_141, %c0_142] : memref<1x32xf32, #tpu.memory_space<vmem>>, vector<1x32xf32>
    %225 = vector.broadcast %224 : vector<1x32xf32> to vector<17x32xf32>
    %226 = arith.addf %223, %225 : vector<17x32xf32>
    %227 = arith.addf %206, %226 : vector<17x32xf32>
    %c0_143 = arith.constant 0 : index
    %c0_144 = arith.constant 0 : index
    %228 = vector.load %arg12[%c0_143, %c0_144] : memref<1x32xf32, #tpu.memory_space<vmem>>, vector<1x32xf32>
    %229 = vector.broadcast %228 : vector<1x32xf32> to vector<17x32xf32>
    %230 = arith.mulf %229, %227 : vector<17x32xf32>
    %231 = arith.addf %1, %230 : vector<17x32xf32>
    %c0_145 = arith.constant 0 : index
    %c0_146 = arith.constant 0 : index
    %232 = vector.load %arg17[%c0_145, %c0_146] : memref<1x32xf32, #tpu.memory_space<vmem>>, vector<1x32xf32>
    %c0_147 = arith.constant 0 : index
    %c0_148 = arith.constant 0 : index
    %233 = vector.load %arg18[%c0_147, %c0_148] : memref<1x32xf32, #tpu.memory_space<vmem>>, vector<1x32xf32>
    %cst_149 = arith.constant dense<0.000000e+00> : vector<17xf32>
    %234 = vector.multi_reduction <add>, %231, %cst_149 [1] : vector<17x32xf32> to vector<17xf32>
    %235 = vector.shape_cast %234 : vector<17xf32> to vector<17x1xf32>
    %cst_150 = arith.constant 3.200000e+01 : f32
    %236 = vector.broadcast %cst_150 : f32 to vector<17x1xf32>
    %237 = arith.divf %235, %236 : vector<17x1xf32>
    %238 = vector.broadcast %237 : vector<17x1xf32> to vector<17x32xf32>
    %239 = arith.subf %231, %238 : vector<17x32xf32>
    %240 = arith.mulf %239, %239 : vector<17x32xf32>
    %cst_151 = arith.constant dense<0.000000e+00> : vector<17xf32>
    %241 = vector.multi_reduction <add>, %240, %cst_151 [1] : vector<17x32xf32> to vector<17xf32>
    %242 = vector.shape_cast %241 : vector<17xf32> to vector<17x1xf32>
    %cst_152 = arith.constant 3.200000e+01 : f32
    %243 = vector.broadcast %cst_152 : f32 to vector<17x1xf32>
    %244 = arith.divf %242, %243 : vector<17x1xf32>
    %245 = vector.broadcast %237 : vector<17x1xf32> to vector<17x32xf32>
    %246 = arith.subf %231, %245 : vector<17x32xf32>
    %cst_153 = arith.constant 9.99999997E-7 : f32
    %247 = vector.broadcast %cst_153 : f32 to vector<17x1xf32>
    %248 = arith.addf %244, %247 : vector<17x1xf32>
    %249 = math.rsqrt %248 : vector<17x1xf32>
    %250 = vector.broadcast %249 : vector<17x1xf32> to vector<17x32xf32>
    %251 = arith.mulf %246, %250 : vector<17x32xf32>
    %252 = vector.broadcast %232 : vector<1x32xf32> to vector<17x32xf32>
    %253 = arith.mulf %251, %252 : vector<17x32xf32>
    %254 = vector.broadcast %233 : vector<1x32xf32> to vector<17x32xf32>
    %255 = arith.addf %253, %254 : vector<17x32xf32>
    %256 = arith.truncf %255 : vector<17x32xf32> to vector<17x32xbf16>
    %c0_154 = arith.constant 0 : index
    %c0_155 = arith.constant 0 : index
    %257 = vector.load %arg19[%c0_154, %c0_155] : memref<32x128xbf16, #tpu.memory_space<vmem>>, vector<32x128xbf16>
    %cst_156 = arith.constant dense<0.000000e+00> : vector<17x128xf32>
    %258 = tpu.matmul %256, %257, %cst_156 {dimension_numbers = #tpu.dot_dimension_numbers<[1], [0], [0], [1], [0, 0, 1, 1], [], []>} : vector<17x32xbf16>, vector<32x128xbf16>, vector<17x128xf32> -> vector<17x128xf32>
    %c0_157 = arith.constant 0 : index
    %c0_158 = arith.constant 0 : index
    %259 = vector.load %arg20[%c0_157, %c0_158] : memref<1x128xf32, #tpu.memory_space<vmem>>, vector<1x128xf32>
    %260 = vector.broadcast %259 : vector<1x128xf32> to vector<17x128xf32>
    %261 = arith.addf %258, %260 : vector<17x128xf32>
    %cst_159 = arith.constant 5.000000e-01 : f32
    %262 = vector.broadcast %cst_159 : f32 to vector<17x128xf32>
    %263 = arith.mulf %262, %261 : vector<17x128xf32>
    %cst_160 = arith.constant 0.707106769 : f32
    %264 = vector.broadcast %cst_160 : f32 to vector<17x128xf32>
    %265 = arith.mulf %261, %264 : vector<17x128xf32>
    %266 = math.erf %265 : vector<17x128xf32>
    %cst_161 = arith.constant 1.000000e+00 : f32
    %267 = vector.broadcast %cst_161 : f32 to vector<17x128xf32>
    %268 = arith.addf %267, %266 : vector<17x128xf32>
    %269 = arith.mulf %263, %268 : vector<17x128xf32>
    %270 = arith.truncf %269 : vector<17x128xf32> to vector<17x128xbf16>
    %c0_162 = arith.constant 0 : index
    %c0_163 = arith.constant 0 : index
    %271 = vector.load %arg21[%c0_162, %c0_163] : memref<128x32xbf16, #tpu.memory_space<vmem>>, vector<128x32xbf16>
    %cst_164 = arith.constant dense<0.000000e+00> : vector<17x32xf32>
    %272 = tpu.matmul %270, %271, %cst_164 {dimension_numbers = #tpu.dot_dimension_numbers<[1], [0], [0], [1], [0, 0, 1, 1], [], []>} : vector<17x128xbf16>, vector<128x32xbf16>, vector<17x32xf32> -> vector<17x32xf32>
    %c0_165 = arith.constant 0 : index
    %c0_166 = arith.constant 0 : index
    %273 = vector.load %arg22[%c0_165, %c0_166] : memref<1x32xf32, #tpu.memory_space<vmem>>, vector<1x32xf32>
    %274 = vector.broadcast %273 : vector<1x32xf32> to vector<17x32xf32>
    %275 = arith.addf %272, %274 : vector<17x32xf32>
    %276 = arith.truncf %275 : vector<17x32xf32> to vector<17x32xbf16>
    %c0_167 = arith.constant 0 : index
    %c0_168 = arith.constant 0 : index
    %277 = vector.load %arg24[%c0_167, %c0_168] : memref<32x16xbf16, #tpu.memory_space<vmem>>, vector<32x16xbf16>
    %cst_169 = arith.constant dense<0.000000e+00> : vector<17x16xf32>
    %278 = tpu.matmul %276, %277, %cst_169 {dimension_numbers = #tpu.dot_dimension_numbers<[1], [0], [0], [1], [0, 0, 1, 1], [], []>} : vector<17x32xbf16>, vector<32x16xbf16>, vector<17x16xf32> -> vector<17x16xf32>
    %c0_170 = arith.constant 0 : index
    %c0_171 = arith.constant 0 : index
    %279 = vector.load %arg25[%c0_170, %c0_171] : memref<1x16xf32, #tpu.memory_space<vmem>>, vector<1x16xf32>
    %280 = vector.broadcast %279 : vector<1x16xf32> to vector<17x16xf32>
    %281 = arith.addf %278, %280 : vector<17x16xf32>
    %cst_172 = arith.constant 5.000000e-01 : f32
    %282 = vector.broadcast %cst_172 : f32 to vector<17x16xf32>
    %283 = arith.mulf %282, %281 : vector<17x16xf32>
    %cst_173 = arith.constant 0.707106769 : f32
    %284 = vector.broadcast %cst_173 : f32 to vector<17x16xf32>
    %285 = arith.mulf %281, %284 : vector<17x16xf32>
    %286 = math.erf %285 : vector<17x16xf32>
    %cst_174 = arith.constant 1.000000e+00 : f32
    %287 = vector.broadcast %cst_174 : f32 to vector<17x16xf32>
    %288 = arith.addf %287, %286 : vector<17x16xf32>
    %289 = arith.mulf %283, %288 : vector<17x16xf32>
    %290 = arith.truncf %289 : vector<17x16xf32> to vector<17x16xbf16>
    %c0_175 = arith.constant 0 : index
    %c0_176 = arith.constant 0 : index
    %291 = vector.load %arg26[%c0_175, %c0_176] : memref<16x32xbf16, #tpu.memory_space<vmem>>, vector<16x32xbf16>
    %cst_177 = arith.constant dense<0.000000e+00> : vector<17x32xf32>
    %292 = tpu.matmul %290, %291, %cst_177 {dimension_numbers = #tpu.dot_dimension_numbers<[1], [0], [0], [1], [0, 0, 1, 1], [], []>} : vector<17x16xbf16>, vector<16x32xbf16>, vector<17x32xf32> -> vector<17x32xf32>
    %c0_178 = arith.constant 0 : index
    %c0_179 = arith.constant 0 : index
    %293 = vector.load %arg27[%c0_178, %c0_179] : memref<1x32xf32, #tpu.memory_space<vmem>>, vector<1x32xf32>
    %294 = vector.broadcast %293 : vector<1x32xf32> to vector<17x32xf32>
    %295 = arith.addf %292, %294 : vector<17x32xf32>
    %296 = arith.addf %275, %295 : vector<17x32xf32>
    %c0_180 = arith.constant 0 : index
    %c0_181 = arith.constant 0 : index
    %297 = vector.load %arg23[%c0_180, %c0_181] : memref<1x32xf32, #tpu.memory_space<vmem>>, vector<1x32xf32>
    %298 = vector.broadcast %297 : vector<1x32xf32> to vector<17x32xf32>
    %299 = arith.mulf %298, %296 : vector<17x32xf32>
    %300 = arith.addf %231, %299 : vector<17x32xf32>
    %c0_182 = arith.constant 0 : index
    %c0_183 = arith.constant 0 : index
    %c0_184 = arith.constant 0 : index
    %301 = vector.load %arg28[%c0_182, %c0_183, %c0_184] : memref<1x17x32xf32, #tpu.memory_space<vmem>>, vector<1x17x32xf32>
    %302 = vector.shape_cast %301 : vector<1x17x32xf32> to vector<17x32xf32>
    %303 = vector.shape_cast %300 : vector<17x32xf32> to vector<1x17x32xf32>
    tpu.vector_store %arg28[%c0_182, %c0_183, %c0_184], %303 {strides = array<i32>} : memref<1x17x32xf32, #tpu.memory_space<vmem>>, vector<1x17x32xf32>,
    return
  }
  func.func @transform_0(%arg0: i32) -> (i32, i32, i32) {
    %c0_i32 = arith.constant 0 : i32
    %c0_i32_0 = arith.constant 0 : i32
    %c0_i32_1 = arith.constant 0 : i32
    return %arg0, %c0_i32, %c0_i32_0 : i32, i32, i32
  }
  func.func @transform_1(%arg0: i32) -> (i32, i32) {
    %c0_i32 = arith.constant 0 : i32
    %c0_i32_0 = arith.constant 0 : i32
    %c0_i32_1 = arith.constant 0 : i32
    return %c0_i32, %c0_i32_0 : i32, i32
  }
  func.func @transform_2(%arg0: i32) -> (i32, i32) {
    %c0_i32 = arith.constant 0 : i32
    %c0_i32_0 = arith.constant 0 : i32
    %c0_i32_1 = arith.constant 0 : i32
    return %c0_i32, %c0_i32_0 : i32, i32
  }
  func.func @transform_3(%arg0: i32) -> (i32, i32, i32) {
    %c0_i32 = arith.constant 0 : i32
    %c0_i32_0 = arith.constant 0 : i32
    %c0_i32_1 = arith.constant 0 : i32
    %c0_i32_2 = arith.constant 0 : i32
    return %c0_i32, %c0_i32_0, %c0_i32_1 : i32, i32, i32
  }
  func.func @transform_4(%arg0: i32) -> (i32, i32, i32) {
    %c0_i32 = arith.constant 0 : i32
    %c0_i32_0 = arith.constant 0 : i32
    %c0_i32_1 = arith.constant 0 : i32
    %c0_i32_2 = arith.constant 0 : i32
    return %c0_i32, %c0_i32_0, %c0_i32_1 : i32, i32, i32
  }
  func.func @transform_5(%arg0: i32) -> (i32, i32, i32) {
    %c0_i32 = arith.constant 0 : i32
    %c0_i32_0 = arith.constant 0 : i32
    %c0_i32_1 = arith.constant 0 : i32
    %c0_i32_2 = arith.constant 0 : i32
    return %c0_i32, %c0_i32_0, %c0_i32_1 : i32, i32, i32
  }
  func.func @transform_6(%arg0: i32) -> (i32, i32, i32) {
    %c0_i32 = arith.constant 0 : i32
    %c0_i32_0 = arith.constant 0 : i32
    %c0_i32_1 = arith.constant 0 : i32
    %c0_i32_2 = arith.constant 0 : i32
    return %c0_i32, %c0_i32_0, %c0_i32_1 : i32, i32, i32
  }
  func.func @transform_7(%arg0: i32) -> (i32, i32, i32) {
    %c0_i32 = arith.constant 0 : i32
    %c0_i32_0 = arith.constant 0 : i32
    %c0_i32_1 = arith.constant 0 : i32
    %c0_i32_2 = arith.constant 0 : i32
    return %c0_i32, %c0_i32_0, %c0_i32_1 : i32, i32, i32
  }
  func.func @transform_8(%arg0: i32) -> (i32, i32, i32) {
    %c0_i32 = arith.constant 0 : i32
    %c0_i32_0 = arith.constant 0 : i32
    %c0_i32_1 = arith.constant 0 : i32
    %c0_i32_2 = arith.constant 0 : i32
    return %c0_i32, %c0_i32_0, %c0_i32_1 : i32, i32, i32
  }
  func.func @transform_9(%arg0: i32) -> (i32, i32, i32) {
    %c0_i32 = arith.constant 0 : i32
    %c0_i32_0 = arith.constant 0 : i32
    %c0_i32_1 = arith.constant 0 : i32
    %c0_i32_2 = arith.constant 0 : i32
    return %c0_i32, %c0_i32_0, %c0_i32_1 : i32, i32, i32
  }
  func.func @transform_10(%arg0: i32) -> (i32, i32) {
    %c0_i32 = arith.constant 0 : i32
    %c0_i32_0 = arith.constant 0 : i32
    %c0_i32_1 = arith.constant 0 : i32
    return %c0_i32, %c0_i32_0 : i32, i32
  }
  func.func @transform_11(%arg0: i32) -> (i32, i32) {
    %c0_i32 = arith.constant 0 : i32
    %c0_i32_0 = arith.constant 0 : i32
    %c0_i32_1 = arith.constant 0 : i32
    return %c0_i32, %c0_i32_0 : i32, i32
  }
  func.func @transform_12(%arg0: i32) -> (i32, i32) {
    %c0_i32 = arith.constant 0 : i32
    %c0_i32_0 = arith.constant 0 : i32
    %c0_i32_1 = arith.constant 0 : i32
    return %c0_i32, %c0_i32_0 : i32, i32
  }
  func.func @transform_13(%arg0: i32) -> (i32, i32) {
    %c0_i32 = arith.constant 0 : i32
    %c0_i32_0 = arith.constant 0 : i32
    %c0_i32_1 = arith.constant 0 : i32
    return %c0_i32, %c0_i32_0 : i32, i32
  }
  func.func @transform_14(%arg0: i32) -> (i32, i32) {
    %c0_i32 = arith.constant 0 : i32
    %c0_i32_0 = arith.constant 0 : i32
    %c0_i32_1 = arith.constant 0 : i32
    return %c0_i32, %c0_i32_0 : i32, i32
  }
  func.func @transform_15(%arg0: i32) -> (i32, i32) {
    %c0_i32 = arith.constant 0 : i32
    %c0_i32_0 = arith.constant 0 : i32
    %c0_i32_1 = arith.constant 0 : i32
    return %c0_i32, %c0_i32_0 : i32, i32
  }
  func.func @transform_16(%arg0: i32) -> (i32, i32) {
    %c0_i32 = arith.constant 0 : i32
    %c0_i32_0 = arith.constant 0 : i32
    %c0_i32_1 = arith.constant 0 : i32
    return %c0_i32, %c0_i32_0 : i32, i32
  }
  func.func @transform_17(%arg0: i32) -> (i32, i32) {
    %c0_i32 = arith.constant 0 : i32
    %c0_i32_0 = arith.constant 0 : i32
    %c0_i32_1 = arith.constant 0 : i32
    return %c0_i32, %c0_i32_0 : i32, i32
  }
  func.func @transform_18(%arg0: i32) -> (i32, i32) {
    %c0_i32 = arith.constant 0 : i32
    %c0_i32_0 = arith.constant 0 : i32
    %c0_i32_1 = arith.constant 0 : i32
    return %c0_i32, %c0_i32_0 : i32, i32
  }
  func.func @transform_19(%arg0: i32) -> (i32, i32) {
    %c0_i32 = arith.constant 0 : i32
    %c0_i32_0 = arith.constant 0 : i32
    %c0_i32_1 = arith.constant 0 : i32
    return %c0_i32, %c0_i32_0 : i32, i32
  }
  func.func @transform_20(%arg0: i32) -> (i32, i32) {
    %c0_i32 = arith.constant 0 : i32
    %c0_i32_0 = arith.constant 0 : i32
    %c0_i32_1 = arith.constant 0 : i32
    return %c0_i32, %c0_i32_0 : i32, i32
  }
  func.func @transform_21(%arg0: i32) -> (i32, i32) {
    %c0_i32 = arith.constant 0 : i32
    %c0_i32_0 = arith.constant 0 : i32
    %c0_i32_1 = arith.constant 0 : i32
    return %c0_i32, %c0_i32_0 : i32, i32
  }
  func.func @transform_22(%arg0: i32) -> (i32, i32) {
    %c0_i32 = arith.constant 0 : i32
    %c0_i32_0 = arith.constant 0 : i32
    %c0_i32_1 = arith.constant 0 : i32
    return %c0_i32, %c0_i32_0 : i32, i32
  }
  func.func @transform_23(%arg0: i32) -> (i32, i32) {
    %c0_i32 = arith.constant 0 : i32
    %c0_i32_0 = arith.constant 0 : i32
    %c0_i32_1 = arith.constant 0 : i32
    return %c0_i32, %c0_i32_0 : i32, i32
  }
  func.func @transform_24(%arg0: i32) -> (i32, i32) {
    %c0_i32 = arith.constant 0 : i32
    %c0_i32_0 = arith.constant 0 : i32
    %c0_i32_1 = arith.constant 0 : i32
    return %c0_i32, %c0_i32_0 : i32, i32
  }
  func.func @transform_25(%arg0: i32) -> (i32, i32) {
    %c0_i32 = arith.constant 0 : i32
    %c0_i32_0 = arith.constant 0 : i32
    %c0_i32_1 = arith.constant 0 : i32
    return %c0_i32, %c0_i32_0 : i32, i32
  }
  func.func @transform_26(%arg0: i32) -> (i32, i32) {
    %c0_i32 = arith.constant 0 : i32
    %c0_i32_0 = arith.constant 0 : i32
    %c0_i32_1 = arith.constant 0 : i32
    return %c0_i32, %c0_i32_0 : i32, i32
  }
  func.func @transform_27(%arg0: i32) -> (i32, i32, i32) {
    %c0_i32 = arith.constant 0 : i32
    %c0_i32_0 = arith.constant 0 : i32
    %c0_i32_1 = arith.constant 0 : i32
    return %arg0, %c0_i32, %c0_i32_0 : i32, i32, i32
  }
}

</mosaic_0001>

<bundles_post_ra>
// kernel: ensemble_forward.7
= control target key start
LH: loop header
LB: loop body
LE: loop exit
PB: predicated region body
PF: predicated region fallthrough
CT: control target
= control target key end

     0   :  { %vm29_vm0 = vcmask 1041409   ;;  %vm32_vm1 = vcmask 254976   ;;  %s288_s0 = inlined_call_operand.vmem [shape: f32[2,17,32], index: 0, kind: input, shape index: {}]   ;;  %s289_s1 = inlined_call_operand.vmem [shape: f32[1,32], index: 1, kind: input, shape index: {}]   ;;  %s290_s2 = inlined_call_operand.vmem [shape: f32[1,32], index: 2, kind: input, shape index: {}]   ;;  %s291_s3 = inlined_call_operand.vmem [shape: bf16[32,10], index: 3, kind: input, shape index: {}]   ;;  %s292_s4 = inlined_call_operand.vmem [shape: f32[1,10], index: 4, kind: input, shape index: {}]   ;;  %s293_s5 = inlined_call_operand.hbm [shape: f32[2,10], index: 5, kind: output, shape index: {}]  }
   0x1   :  { %v22_v0 = vld [vmem:[%s288_s0] sm:$0xff]  ;;  %v23_v1 = vld [vmem:[%s288_s0 + $0x18] sm:$0xff] }
   0x2   :  { %v28_v2 = vrot.slane %v23_v1, 7 }
   0x3   :  { %10 = vsyncpa [#allocation3], 0  ;;  %v191_v15 = vld [vmem:[%s291_s3] sm:$0xff]   ;;  %v219_v16 = vmov 0.0   ;;  %vm220_vm2 = vmmov 0   ;;  %v192_v17 = vld [vmem:[%s291_s3 + $0x8] sm:$0xff]  }
   0x4   :  { %v30_v3 = vsel %vm29_vm0, %v28_v2, %v22_v0  ;;  %180 = vmatprep.subr.bf16.mxu0 %v219_v16  ;;  %184 = vmatprep.mubr.msk.bf16.mxu0 %vm220_vm2, %v219_v16  ;;  %v171_v22 = vld [vmem:[%s289_s1] ss:$0 sm:$0xff]  ;;  %vm111_vm3 = vcmask 261120   ;;  %vm155_vm4 = vcmask 74752  }
   0x5   :  { %v33_v4 = vsel %vm32_vm1, %v30_v3, 0.0  ;;  %181 = vmatpush3.bf16.msra.mxu0 %v191_v15  ;;  %v172_v25 = vld [vmem:[%s290_s2] ss:$0 sm:$0xff]  ;;  %s221_s2 = smov [#allocation2]  }
   0x6   :  { %34 = vadd.xlane.f32.xlu0 %v33_v4  ;;  %182 = vmatprep.subr.bf16.mxu0 %v219_v16  ;;  %v173_v38 = vld [vmem:[%s292_s4] ss:$0 sm:$0xff]  ;;  %s163_s29 = sshll.u32 %s221_s2, 4  ;;  %s164_s29 = int_to_ptr.vmem [resolvable:$true] %s163_s29 }
   0x7   :  { %s195_s30 = scalar_lea.vmem %s164_s29, 32  ;;  %p200_p1 = scmp.lt.s32.totalorder %s164_s29, %s164_s29 }
   0x8   :  { %p196_p0 = scmp.ne.s32.totalorder %s164_s29, %s195_s30  ;;  %p201_p2 = scmp.lt.s32.totalorder %s195_s30, %s195_s30 }
   0x9   :  { %183 = vmatpush3.bf16.msra.mxu0 %v192_v17 }
   0xa   :  { %p202_p3 = por %p201_p2, %p200_p1 }
   0xc   :  { %p203_p4 = pnand %p202_p3, %p196_p0 }
  0x93   :  { %v35_v5 = vpop.xlane.xlu0 %34 }
  0x94   :  { %v37_v6 = vmul.f32 0.03125, %v35_v5 }
  0x96   :  { %v39_v7 = vrot.slane %v37_v6, 1  ;;  %v42_v8 = vsub.f32 %v22_v0, %v37_v6 }
  0x98   :  { %v43_v9 = vsub.f32 %v23_v1, %v39_v7  ;;  %v44_v11 = vmul.f32 %v42_v8, %v42_v8 }
  0x9a   :  { %v45_v10 = vmul.f32 %v43_v9, %v43_v9 }
  0x9c   :  { %v48_v12 = vrot.slane %v45_v10, 7 }
  0x9e   :  { %v49_v13 = vsel %vm29_vm0, %v48_v12, %v44_v11 }
  0x9f   :  { %v51_v14 = vsel %vm32_vm1, %v49_v13, 0.0 }
  0xa0   :  { %52 = vadd.xlane.f32.xlu0 %v51_v14 }
 0x12d   :  { %v53_v18 = vpop.xlane.xlu0 %52 }
 0x12e   :  { %v54_v19 = vmul.f32 0.03125, %v53_v18 }
 0x130   :  { %v55_v20 = vadd.f32 1e-06, %v54_v19 }
 0x132   :  { %193 = vrsqrt.f32 %v55_v20 }
 0x13c   :  { %v194_v21 = vpop.eup %193 }
 0x13d   :  { %v58_v23 = vrot.slane %v194_v21, 1  ;;  %v61_v24 = vmul.f32 %v194_v21, %v42_v8 }
 0x13f   :  { %v62_v26 = vmul.f32 %v58_v23, %v43_v9  ;;  %v69_v27 = vmul.f32 %v171_v22, %v61_v24 }
 0x141   :  { %v70_v28 = vmul.f32 %v171_v22, %v62_v26  ;;  %v77_v29 = vadd.f32 %v172_v25, %v69_v27 }
 0x143   :  { %v78_v30 = vadd.f32 %v172_v25, %v70_v28  ;;  %v79_v31 = vpack.c.bf16 %v77_v29, %v77_v29 }
 0x145   :  { %v80_v32 = vpack.c.bf16 %v78_v30, %v78_v30  ;;  %v94_v34 = vunpack.c.l.b16 %v79_v31 }
 0x147   :  { %v95_v33 = vunpack.c.l.b16 %v80_v32 }
 0x149   :  { %v96_v35 = vrot.slane %v95_v33, 7 }
 0x14b   :  { %v97_v36 = vsel %vm29_vm0, %v96_v35, %v94_v34 }
 0x14c   :  { %v98_v37 = vpack.c.b16 %v97_v36, %v97_v36 }
 0x14e   :  { %185 = vmatmul.mubr.msk.bf16.vlgmr.msra.gmra.mrb[0].mxu0 %vm111_vm3, %v98_v37 }
 0x221   :  { %v149_v39 = vpop.f32.mrb[0].mxu0 }
 0x222   :  { %v150_v40 = vadd.f32 %v173_v38, %v149_v39  ;;  %v186_v41 = vpop.f32.mrb[1].mxu0 }
 0x223   :  { %v152_v42 = vpop.f32.mrb[2].mxu0 }
 0x224   :  { %v187_v43 = vpop.f32.mrb[3].mxu0  ;;  %156 = vst.msk [vmem:[#allocation2] sm:$0x3] %vm155_vm4, %v150_v40 }
 0x225   :  { %206 = shalt.err (!%p203_p4)
}
 0x226   :  { %s207_s4 = scalar_lea.hbm %s293_s5, 32 }
 0x227   :  { %p208_p5 = scmp.ne.s32.totalorder %s293_s5, %s207_s4  ;;  %p211_p6 = scmp.lt.u32.totalorder %s207_s4, %s293_s5 }
 0x229   :  { %p213_p7 = pnand %p211_p6, %p208_p5 }
 0x22b   :  { %216 = shalt.err (!%p213_p7)
}
 0x22c   :  { %166 = dma.vmem_to_hbm [thread:$0]  %s164_s29, 32, %s293_s5, [#allocation3]  }
 0x22d   :  { %217 = dma.done.wait [#allocation3], 32  }
 0x22e   :  { %218 = vsyncadd [#allocation3], 4294967264 }
 0x22f   :  { %170 = vsyncpa [#allocation3], 1 }

// kernel: ensemble_forward.4
= control target key start
LH: loop header
LB: loop body
LE: loop exit
PB: predicated region body
PF: predicated region fallthrough
CT: control target
= control target key end

     0   :  { %s466_s18 = smov 0   ;;  %s507_s0 = inlined_call_operand.vmem [shape: f32[2,16,48], index: 0, kind: input, shape index: {}]   ;;  %s508_s1 = inlined_call_operand.vmem [shape: bf16[48,32], index: 1, kind: input, shape index: {}]   ;;  %s509_s2 = inlined_call_operand.vmem [shape: f32[1,32], index: 2, kind: input, shape index: {}]   ;;  %s510_s3 = inlined_call_operand.vmem [shape: f32[1,32], index: 3, kind: input, shape index: {}]   ;;  %s511_s4 = inlined_call_operand.vmem [shape: f32[17,32], index: 4, kind: input, shape index: {}]   ;;  %s512_s5 = inlined_call_operand.vmem [shape: f32[2,17,32], index: 5, kind: output, shape index: {}]  }
   0x1 LB: > { %s382_s19 = sadd.s32 4294967295, %s432_s18   ;;  %p386_p0 = scmp.ge.s32.totalorder %s432_s18, 1  ;;  %s432_s18 = sphi %s466_s18, %s15_s18  }
   0x2   : > { %p187_p1 = scmp.lt.s32.totalorder %s432_s18, 3 }
   0x4   : > { %p188_p2 = pnand %p386_p0, %p187_p1 }
   0x5   : > { %v423_v0 = vld [vmem:[%s508_s1] sm:$0xff] (!%p188_p2)   ;;  %v434_v1 = vmov (!%p188_p2), 0.0   ;;  %v424_v2 = vld [vmem:[%s508_s1 + $0x8] sm:$0xff] (!%p188_p2)   ;;  %vm435_vm0 = vmmov (!%p188_p2), 0   ;;  %p215_p3 = scmp.lt.s32.totalorder (!%p188_p2), %s382_s19, 1  ;;  %v425_v3 = vld [vmem:[%s508_s1 + $0x10] sm:$0xff] (!%p188_p2)  }
   0x6   : > { %191 = sbr.rel (%p188_p2) target bundleno = 241 (0xf1), region = 40  ;;  %402 = vmatprep.subr.bf16.mxu0 (!%p188_p2), %v434_v1  ;;  %408 = vmatprep.mubr.msk.bf16.mxu0 (!%p188_p2), %vm435_vm0, %v434_v1  ;;  %vm260_vm1 = vcmask (!%p188_p2), 392192   ;;  %v390_v7 = vld [vmem:[%s509_s2] ss:$0 sm:$0xff] (!%p188_p2)  ;;  %vm308_vm2 = vcmask (!%p188_p2), 1040384   ;;  %v317_v20 = vld [vmem:[%s511_s4 + $0x8] sm:$0xff] (!%p188_p2) }
   0x7   : > { %403 = vmatpush3.bf16.msra.mxu0 (!%p188_p2), %v423_v0  ;;  %v305_v11 = vld [vmem:[%s510_s3] sm:$0x1] (!%p188_p2)  ;;  %v318_v17 = vld [vmem:[%s511_s4 + $0x10] sm:$0x1] (!%p188_p2)  ;;  %vm322_vm3 = vcmask (!%p188_p2), 261120   ;;  %vm325_vm4 = vcmask (!%p188_p2), 253952  }
   0x8   : > { %404 = vmatprep.subr.bf16.mxu0 (!%p188_p2), %v434_v1  ;;  %v316_v14 = vld [vmem:[%s511_s4] sm:$0xff] (!%p188_p2) }
   0xb   : > { %405 = vmatpush3.bf16.msra.mxu0 (!%p188_p2), %v424_v2 }
   0xc   : > { %406 = vmatprep.subr.bf16.mxu0 (!%p188_p2), %v434_v1 }
   0xd   : > { %s514_s19 = smov (!%p215_p3, %s382_s19), 1 }
   0xe   : > { %s397_s26 = sshll.u32 %s514_s19, 4  ;;  %s412_s7 = smul.u32 24, %s514_s19 }
   0xf   : > { %s219_s29 = scalar_lea.vmem %s507_s0, %s397_s26  ;;  %407 = vmatpush3.bf16.msra.mxu0 %v425_v3 }
  0x10   : > { %v226_v4 = vld [vmem:[%s219_s29] sm:$0xff]  ;;  %v227_v5 = vld [vmem:[%s219_s29 + $0x8] sm:$0xff]  ;;  %s224_s16 = scalar_lea.vmem %s512_s5, %s412_s7 }
  0x11   : > { %v228_v6 = vpack.c.bf16 %v227_v5, %v226_v4 }
  0x13   : > { %409 = vmatmul.mubr.msk.bf16.vlgmr.msra.gmra.mrb[0].mxu0 %vm260_vm1, %v228_v6 }
  0xe6   : > { %v298_v8 = vpop.f32.mrb[0].mxu0 }
  0xe7   : > { %v299_v9 = vadd.f32 %v390_v7, %v298_v8  ;;  %v410_v10 = vpop.f32.mrb[1].mxu0 }
  0xe8   : > { %v301_v12 = vpop.f32.mrb[2].mxu0 }
  0xe9   : > { %v309_v13 = vrot.slane %v299_v9, 7  ;;  %v302_v15 = vadd.f32 %v390_v7, %v301_v12  ;;  %v411_v16 = vpop.f32.mrb[3].mxu0 }
  0xeb   : > { %v315_v18 = vsel %vm308_vm2, %v305_v11, %v309_v13  ;;  %v310_v19 = vrot.slane %v302_v15, 7 }
  0xec   : > { %v319_v21 = vadd.f32 %v316_v14, %v315_v18 }
  0xed   : > { %v311_v22 = vsel %vm308_vm2, %v309_v13, %v310_v19  ;;  %v321_v23 = vadd.f32 %v318_v17, %v310_v19 }
  0xee   : > { %v320_v24 = vadd.f32 %v317_v20, %v311_v22  ;;  %323 = vst.msk [vmem:[%s224_s16] sm:$0xff] %vm322_vm3, %v319_v21 }
  0xef   : > { %326 = vst.msk [vmem:[%s224_s16 + $0x10] sm:$0x1] %vm325_vm4, %v321_v23 }
  0xf0   : > { %324 = vst.msk [vmem:[%s224_s16 + $0x8] sm:$0xff] %vm322_vm3, %v320_v24 }
  0xf1 PF: > { %s15_s18 = sadd.s32 1, %s432_s18  }
  0xf2   : > { %p12_p4 = scmp.ge.s32.totalorder %s15_s18, 4  }
  0xf4   :  { %14 = sbr.rel (!%p12_p4) target bundleno = 1 (0x1), region = 70 }

// kernel: ensemble_forward.5
= control target key start
LH: loop header
LB: loop body
LE: loop exit
PB: predicated region body
PF: predicated region fallthrough
CT: control target
= control target key end

     0   :  { %s4649_s0 = inlined_call_operand.vmem [shape: f32[2,17,32], index: 0, kind: input, shape index: {}]   ;;  %s4650_s1 = inlined_call_operand.vmem [shape: f32[1,32], index: 1, kind: input, shape index: {}]   ;;  %s4651_s2 = inlined_call_operand.vmem [shape: f32[1,32], index: 2, kind: input, shape index: {}]   ;;  %s4652_s3 = inlined_call_operand.vmem [shape: bf16[4,32,8], index: 3, kind: input, shape index: {}]   ;;  %s4653_s4 = inlined_call_operand.vmem [shape: f32[4,1,8], index: 4, kind: input, shape index: {}]   ;;  %s4654_s5 = inlined_call_operand.vmem [shape: bf16[4,32,8], index: 5, kind: input, shape index: {}]   ;;  %s4655_s6 = inlined_call_operand.vmem [shape: f32[4,1,8], index: 6, kind: input, shape index: {}]   ;;  %s4656_s7 = inlined_call_operand.vmem [shape: bf16[4,32,8], index: 7, kind: input, shape index: {}]   ;;  %s4657_s8 = inlined_call_operand.vmem [shape: f32[4,1,8], index: 8, kind: input, shape index: {}]   ;;  %s4658_s9 = inlined_call_operand.vmem [shape: bf16[4,8,32], index: 9, kind: input, shape index: {}]   ;;  %s4659_s10 = inlined_call_operand.vmem [shape: f32[1,32], index: 10, kind: input, shape index: {}]   ;;  %s4660_s11 = inlined_call_operand.vmem [shape: f32[1,32], index: 11, kind: input, shape index: {}]   ;;  %s4661_s12 = inlined_call_operand.vmem [shape: bf16[32,16], index: 12, kind: input, shape index: {}]   ;;  %s4662_s13 = inlined_call_operand.vmem [shape: f32[1,16], index: 13, kind: input, shape index: {}]   ;;  %s4663_s14 = inlined_call_operand.vmem [shape: bf16[16,32], index: 14, kind: input, shape index: {}]   ;;  %s4664_s15 = inlined_call_operand.vmem [shape: f32[1,32], index: 15, kind: input, shape index: {}]   ;;  %s4665_s16 = inlined_call_operand.vmem [shape: f32[1,32], index: 16, kind: input, shape index: {}]   ;;  %s4666_s17 = inlined_call_operand.vmem [shape: f32[1,32], index: 17, kind: input, shape index: {}]   ;;  %s4667_s18 = inlined_call_operand.vmem [shape: bf16[32,128], index: 18, kind: input, shape index: {}]   ;;  %s4668_s19 = inlined_call_operand.vmem [shape: f32[1,128], index: 19, kind: input, shape index: {}]   ;;  %s4669_s20 = inlined_call_operand.vmem [shape: bf16[128,32], index: 20, kind: input, shape index: {}]   ;;  %s4670_s21 = inlined_call_operand.vmem [shape: f32[1,32], index: 21, kind: input, shape index: {}]   ;;  %s4671_s22 = inlined_call_operand.vmem [shape: f32[1,32], index: 22, kind: input, shape index: {}]   ;;  %s4672_s23 = inlined_call_operand.vmem [shape: bf16[32,16], index: 23, kind: input, shape index: {}]   ;;  %s4673_s24 = inlined_call_operand.vmem [shape: f32[1,16], index: 24, kind: input, shape index: {}]   ;;  %s4674_s25 = inlined_call_operand.vmem [shape: bf16[16,32], index: 25, kind: input, shape index: {}]   ;;  %s4675_s26 = inlined_call_operand.vmem [shape: f32[1,32], index: 26, kind: input, shape index: {}]   ;;  %s4676_s27 = inlined_call_operand.vmem [shape: f32[2,17,32], index: 27, kind: output, shape index: {}]  }
   0x1   :  { %4687 = sst [smem:[#allocation3_spill]] %s4649_s0 }
   0x2   :  { %4688 = sst [smem:[#allocation4_spill]] %s4650_s1 }
   0x3   :  { %4689 = sst [smem:[#allocation5_spill]] %s4651_s2 }
   0x4   :  { %4690 = sst [smem:[#allocation6_spill]] %s4652_s3 }
   0x5   :  { %4691 = sst [smem:[#allocation7_spill]] %s4653_s4 }
   0x6   :  { %4692 = sst [smem:[#allocation8_spill]] %s4654_s5 }
   0x7   :  { %4693 = sst [smem:[#allocation9_spill]] %s4655_s6 }
   0x8   :  { %4694 = sst [smem:[#allocation10_spill]] %s4656_s7  ;;  %s4200_s7 = smov 0  }
   0x9   :  { %4695 = sst [smem:[#allocation11_spill]] %s4657_s8 }
   0xa   :  { %4696 = sst [smem:[#allocation12_spill]] %s4658_s9 }
   0xb   :  { %4697 = sst [smem:[#allocation13_spill]] %s4659_s10 }
   0xc   :  { %4698 = sst [smem:[#allocation14_spill]] %s4660_s11 }
   0xd LB: > { %4699 = sst [smem:[#allocation2_spill]] %s4057_s7  ;;  %s3368_s4 = sadd.s32 4294967295, %s4057_s7   ;;  %s4057_s7 = sphi %s4200_s7, %s37_s7  }
   0xe   : > { %p3372_p0 = scmp.ge.s32.totalorder %s4057_s7, 1  ;;  %p737_p1 = scmp.lt.s32.totalorder %s4057_s7, 3 }
  0x10   : > { %p738_p2 = pnand %p3372_p0, %p737_p1 }
  0x11   : > { %p809_p3 = scmp.lt.s32.totalorder (!%p738_p2), %s3368_s4, 1  ;;  %vm825_vm0 = vcmask (!%p738_p2), 261120   ;;  %vm832_vm1 = vcmask (!%p738_p2), 253952   ;;  %s4700_s5 = sld [smem:[#allocation3_spill]] (!%p738_p2)  ;;  %vm1110_vm2 = vcmask (!%p738_p2), 64512   ;;  %vm1219_vm3 = vcmask (!%p738_p2), 1040384  }
  0x12   : > { %741 = sbr.rel (%p738_p2) target bundleno = 5996 (0x176c), region = 128  ;;  %s4701_s29 = sld [smem:[#allocation6_spill]] (!%p738_p2)  ;;  %vm1174_vm4 = vcmask (!%p738_p2), 138240   ;;  %vm1181_vm5 = vcmask (!%p738_p2), 131072   ;;  %vm1666_vm6 = vcmask (!%p738_p2), 1043456   ;;  %vm2784_vm7 = vcmask (!%p738_p2), 130048  }
  0x13   : > { %s4702_s11 = sld [smem:[#allocation8_spill]] (!%p738_p2)  ;;  %s4703_s10 = sld [smem:[#allocation10_spill]] (!%p738_p2) }
  0x14   : > { %s4704_s2 = sld [smem:[#allocation4_spill]] (!%p738_p2)  ;;  %s4705_s9 = sld [smem:[#allocation5_spill]] (!%p738_p2) }
  0x15   : > { %s4708_s1 = sld [smem:[#allocation11_spill]] (!%p738_p2)  ;;  %s4709_s6 = sld [smem:[#allocation12_spill]] (!%p738_p2) }
  0x16   : > { %s4711_s0 = sld [smem:[#allocation14_spill]] (!%p738_p2) }
  0x18   : > { %v3930_v21 = vld [vmem:[%s4701_s29] sm:$0xff] (!%p738_p2)   ;;  %v3932_v23 = vld [vmem:[%s4701_s29 + $0x8] sm:$0xff] (!%p738_p2)  }
  0x19   : > { %s4715_s4 = smov (!%p809_p3, %s3368_s4), 1  ;;  %v3931_v22 = vld [vmem:[%s4702_s11] sm:$0xff]   ;;  %3668 = vmatprep.subr.bf16.mxu0 %v3930_v21  ;;  %v3933_v24 = vld [vmem:[%s4702_s11 + $0x8] sm:$0xff]  }
  0x1a   : > { %s4684_s8 = smul.u32 24, %s4715_s4  ;;  %3676 = vmatprep.subr.bf16.mxu1 %v3931_v22  ;;  %3669 = vmatpush3.bf16.msra.mxu0 %v3930_v21  ;;  %v3934_v25 = vld [vmem:[%s4703_s10] sm:$0xff]   ;;  %v3935_v51 = vld [vmem:[%s4703_s10 + $0x8] sm:$0xff]  }
  0x1b   : > { %3677 = vmatpush3.bf16.msra.mxu1 %v3931_v22  ;;  %3670 = vmatprep.subr.bf16.mxu0 %v3932_v23  ;;  %v3375_v37 = vld [vmem:[%s4704_s2] ss:$0 sm:$0xff]  ;;  %s4706_s2 = sld [smem:[#allocation9_spill]] }
  0x1c   : > { %s4216_s28 = scalar_lea.vmem %s4700_s5, %s4684_s8  ;;  %3678 = vmatprep.subr.bf16.mxu1 %v3933_v24  ;;  %v3376_v43 = vld [vmem:[%s4705_s9] ss:$0 sm:$0xff]  ;;  %s4707_s9 = sld [smem:[#allocation7_spill]] }
  0x1d   : > { %v820_v0 = vld [vmem:[%s4216_s28] sm:$0xff]  ;;  %v822_v1 = vld [vmem:[%s4216_s28 + $0x10] sm:$0x1]  ;;  %v821_v2 = vld [vmem:[%s4216_s28 + $0x8] sm:$0xff] }
  0x1e   : > { %v826_v3 = vsel %vm825_vm0, %v820_v0, 0.0  ;;  %v833_v4 = vsel %vm832_vm1, %v822_v1, 0.0  ;;  %v829_v5 = vsel %vm825_vm0, %v821_v2, 0.0  ;;  %3671 = vmatpush3.bf16.msra.mxu0 %v3932_v23 }
  0x1f   : > { %827 = vadd.xlane.f32.xlu0 %v826_v3  ;;  %834 = vadd.xlane.f32.xlu1 %v833_v4 }
  0x20   : > { %3679 = vmatpush3.bf16.msra.mxu1 %v3933_v24  ;;  %3684 = vmatprep.subr.bf16.mxu0 %v3934_v25  ;;  %v3937_v24 = vld [vmem:[%s4702_s11 + $0x18] sm:$0xff]  }
  0x21   : > { %v3382_v54 = vld [vmem:[%s4706_s2] ss:$0 sm:$0xff] }
  0x22   : > { %v3377_v55 = vld [vmem:[%s4707_s9] ss:$0 sm:$0xff] }
  0x23   : > { %830 = vadd.xlane.f32.xlu0 %v829_v5  ;;  %v3387_v5 = vld [vmem:[%s4708_s1] ss:$0 sm:$0xff] }
  0xac   : > { %v828_v6 = vpop.xlane.xlu0 %827  ;;  %v835_v7 = vpop.xlane.xlu1 %834 }
  0xad   : > { %v837_v8 = vmul.f32 0.03125, %v828_v6  ;;  %v839_v9 = vmul.f32 0.03125, %v835_v7 }
  0xaf   : > { %v840_v10 = vsub.f32 %v820_v0, %v837_v8  ;;  %v842_v11 = vsub.f32 %v822_v1, %v839_v9 }
  0xb0   : > { %v831_v12 = vpop.xlane.xlu0 %830 }
  0xb1   : > { %v838_v13 = vmul.f32 0.03125, %v831_v12  ;;  %v843_v14 = vmul.f32 %v840_v10, %v840_v10  ;;  %v845_v15 = vmul.f32 %v842_v11, %v842_v11 }
  0xb3   : > { %v841_v16 = vsub.f32 %v821_v2, %v838_v13  ;;  %v846_v17 = vsel %vm825_vm0, %v843_v14, 0.0  ;;  %v852_v18 = vsel %vm832_vm1, %v845_v15, 0.0 }
  0xb4   : > { %847 = vadd.xlane.f32.xlu1 %v846_v17 }
  0xb5   : > { %v844_v19 = vmul.f32 %v841_v16, %v841_v16 }
  0xb7   : > { %v849_v20 = vsel %vm825_vm0, %v844_v19, 0.0  ;;  %v3936_v19 = vld [vmem:[%s4702_s11 + $0x10] sm:$0xff]  }
  0xb8   : > { %853 = vadd.xlane.f32.xlu1 %v852_v18  ;;  %850 = vadd.xlane.f32.xlu0 %v849_v20 }
 0x141   : > { %v848_v26 = vpop.xlane.xlu1 %847 }
 0x142   : > { %v855_v27 = vmul.f32 0.03125, %v848_v26 }
 0x144   : > { %v858_v28 = vadd.f32 1e-06, %v855_v27 }
 0x145   : > { %v854_v29 = vpop.xlane.xlu1 %853  ;;  %v851_v30 = vpop.xlane.xlu0 %850 }
 0x146   : > { %3970 = vrsqrt.f32 %v858_v28  ;;  %v857_v31 = vmul.f32 0.03125, %v854_v29  ;;  %v856_v32 = vmul.f32 0.03125, %v851_v30 }
 0x148   : > { %v860_v33 = vadd.f32 1e-06, %v857_v31  ;;  %v859_v34 = vadd.f32 1e-06, %v856_v32 }
 0x14a   : > { %3972 = vrsqrt.f32 %v860_v33 }
 0x14b   : > { %3974 = vrsqrt.f32 %v859_v34 }
 0x150   : > { %v3971_v35 = vpop.eup %3970 }
 0x151   : > { %v864_v36 = vmul.f32 %v3971_v35, %v840_v10 }
 0x153   : > { %v873_v41 = vmul.f32 %v3375_v37, %v864_v36  ;;  %v3411_v36 = vld [vmem:[%s4706_s2 + $0x1] ss:$0 sm:$0xff] }
 0x154   : > { %v3973_v38 = vpop.eup %3972 }
 0x155   : > { %v3975_v39 = vpop.eup %3974  ;;  %v866_v40 = vmul.f32 %v3973_v38, %v842_v11  ;;  %v882_v47 = vadd.f32 %v3376_v43, %v873_v41 }
 0x156   : > { %v865_v42 = vmul.f32 %v3975_v39, %v841_v16  ;;  %v4059_v16 = vmov 0  }
 0x157   : > { %v875_v44 = vmul.f32 %v3375_v37, %v866_v40  ;;  %v4280_v17 = vsel %vm1219_vm3, 65535, %v4059_v16 }
 0x158   : > { %v874_v45 = vmul.f32 %v3375_v37, %v865_v42 }
 0x159   : > { %v884_v46 = vadd.f32 %v3376_v43, %v875_v44 }
 0x15a   : > { %v883_v48 = vadd.f32 %v3376_v43, %v874_v45 }
 0x15b   : > { %v4248_v49 = vpack.c.bf16 %v884_v46, %v884_v46 }
 0x15c   : > { %v4250_v50 = vpack.c.bf16 %v883_v48, %v882_v47 }
 0x15e   : > { %3672 = vmatprep.mubr.msk.bf16.mxu0 %vm825_vm0, %v4250_v50  ;;  %3680 = vmatprep.mubr.msk.bf16.mxu1 %vm825_vm0, %v4250_v50 }
 0x15f   : > { %3673 = vmatmul.mubr.msk.bf16.vlgmr.msra.gmra.mrb[0].mxu0 %vm825_vm0, %v4248_v49  ;;  %3681 = vmatmul.mubr.msk.bf16.vlgmr.msra.gmra.mrb[0].mxu1 %vm825_vm0, %v4248_v49 }
 0x160   : > { %3685 = vmatpush3.bf16.msra.mxu0 %v3934_v25  ;;  %3688 = vmatprep.mubr.msk.bf16.mxu0 %vm825_vm0, %v4250_v50 }
 0x161   : > { %3686 = vmatprep.subr.bf16.mxu0 %v3935_v51 }
 0x164   : > { %3687 = vmatpush3.bf16.msra.mxu0 %v3935_v51 }
 0x167   : > { %3689 = vmatmul.mubr.msk.bf16.vlgmr.msra.gmra.mrb[4].mxu0 %vm825_vm0, %v4248_v49 }
 0x232   : > { %v3674_v52 = vpop.f32.mrb[0].mxu0  ;;  %v3682_v53 = vpop.f32.mrb[0].mxu1 }
 0x233   : > { %v950_v56 = vpop.f32.mrb[1].mxu0  ;;  %v1021_v57 = vpop.f32.mrb[1].mxu1  ;;  %v1030_v60 = vadd.f32 %v3682_v53, %v3382_v54  ;;  %v959_v22 = vadd.f32 %v3674_v52, %v3377_v55 }
 0x234   : > { %v3675_v58 = vpop.f32.mrb[2].mxu0  ;;  %v3683_v59 = vpop.f32.mrb[2].mxu1  ;;  %v951_v63 = vadd.f32 %v3377_v55, %v950_v56  ;;  %v1022_v0 = vadd.f32 %v3382_v54, %v1021_v57 }
 0x235   : > { %v953_v61 = vpop.f32.mrb[3].mxu0  ;;  %v1024_v62 = vpop.f32.mrb[3].mxu1  ;;  %v1109_v6 = vpack.c.bf16 %v1030_v60, %v1030_v60  ;;  %v1107_v23 = vpack.c.bf16 %v959_v22, %v959_v22 }
 0x236   : > { %v954_v1 = vadd.f32 %v3377_v55, %v953_v61  ;;  %v1025_v2 = vadd.f32 %v3382_v54, %v1024_v62 }
 0x237   : > { %v1121_v20 = vsel %vm1110_vm2, %v1109_v6, 0 }
 0x238   : > { %v1106_v3 = vpack.c.bf16 %v954_v1, %v951_v63  ;;  %v1108_v4 = vpack.c.bf16 %v1025_v2, %v1022_v0  ;;  %v3938_v0 = vld [vmem:[%s4701_s29 + $0x10] sm:$0xff]  }
 0x23a   : > { %v3690_v7 = vpop.f32.mrb[4].mxu0  ;;  %3908 = vmatprep.subr.msk.bf16.mxu1 %vm1110_vm2, %v1108_v4  ;;  %3696 = vmatprep.mubr.msk.bf16.mxu1 %vm1110_vm2, %v1106_v3  ;;  %v1118_v8 = vsel %vm1110_vm2, %v1108_v4, 0 }
 0x23b   : > { %v1101_v9 = vadd.f32 %v3690_v7, %v3387_v5  ;;  %v1092_v10 = vpop.f32.mrb[5].mxu0  ;;  %3693 = vmatpush3.bf16.xpose.msra.mxu1 %v1118_v8 }
 0x23c   : > { %v3691_v11 = vpop.f32.mrb[6].mxu0  ;;  %3909 = vmatprep.subr.msk.bf16.mxu1 %vm1110_vm2, %v1109_v6  ;;  %v1093_v14 = vadd.f32 %v3387_v5, %v1092_v10 }
 0x23d   : > { %v1095_v12 = vpop.f32.mrb[7].mxu0  ;;  %v1212_v13 = vpack.c.bf16 %v1101_v9, %v1101_v9 }
 0x23e   : > { %v1096_v15 = vadd.f32 %v3387_v5, %v1095_v12  ;;  %v3939_v12 = vld [vmem:[%s4701_s29 + $0x18] sm:$0xff]  }
 0x23f   : > { %v1223_v21 = vand.u32 %v4280_v17, %v1212_v13  ;;  %v3940_v13 = vld [vmem:[%s4703_s10 + $0x10] sm:$0xff]  }
 0x240   : > { %v1211_v18 = vpack.c.bf16 %v1096_v15, %v1093_v14  ;;  %v3941_v14 = vld [vmem:[%s4703_s10 + $0x18] sm:$0xff]   ;;  %v1275_v15 = vld [vmem:[%s4709_s6] sm:$0xf] }
 0x242   : > { %3700 = vmatprep.subr.bf16.mxu0 %v1211_v18 }
 0x243   : > { %3695 = vmatpush3.bf16.xpose.msra.mxu1 %v1121_v20  ;;  %3701 = vmatpush3.bf16.msra.mxu0 %v1211_v18 }
 0x244   : > { %3702 = vmatprep.subr.bf16.mxu0 %v1223_v21  ;;  %3716 = vmatprep.subr.bf16.mxu1 %v3936_v19 }
 0x247   : > { %3703 = vmatpush3.bf16.msra.mxu0 %v1223_v21 }
 0x248   : > { %3708 = vmatprep.subr.bf16.mxu0 %v3938_v0 }
 0x24a   : > { %3697 = vmatmul.mubr.msk.bf16.vlgmr.msra.gmra.mrb[4].mxu1 %vm1110_vm2, %v1107_v23  ;;  %v3401_v23 = vld [vmem:[%s4707_s9 + $0x1] ss:$0 sm:$0xff] }
 0x24b   : > { %3717 = vmatpush3.bf16.msra.mxu1 %v3936_v19  ;;  %3720 = vmatprep.mubr.msk.bf16.mxu1 %vm825_vm0, %v4250_v50 }
 0x24c   : > { %3718 = vmatprep.subr.bf16.mxu1 %v3937_v24 }
 0x24f   : > { %3719 = vmatpush3.bf16.msra.mxu1 %v3937_v24 }
 0x252   : > { %3721 = vmatmul.mubr.msk.bf16.vlgmr.msra.gmra.mrb[8].mxu1 %vm825_vm0, %v4248_v49 }
 0x31d   : > { %v3698_v25 = vpop.f32.mrb[4].mxu1 }
 0x31e   : > { %v1157_v26 = vpop.f32.mrb[5].mxu1  ;;  %v1173_v30 = vmul.f32 0.35355338, %v3698_v25 }
 0x31f   : > { %v1171_v27 = vmul.f32 0.35355338, %v1157_v26  ;;  %v3699_v28 = vpop.f32.mrb[6].mxu1 }
 0x320   : > { %v1160_v29 = vpop.f32.mrb[7].mxu1  ;;  %v1182_v35 = vsel %vm1181_vm5, %v1173_v30, -inf }
 0x321   : > { %v1172_v31 = vmul.f32 0.35355338, %v1160_v29  ;;  %v1175_v32 = vsel %vm1174_vm4, %v1171_v27, -inf }
 0x322   : > { %1176 = vmax.xlane.f32.xlu0 %v1175_v32 }
 0x323   : > { %v1178_v33 = vsel %vm1174_vm4, %v1172_v31, -inf }
 0x324   : > { %1179 = vmax.xlane.f32.xlu1 %v1178_v33  ;;  %v1725_v33 = vsel %vm1666_vm6, %v1275_v15, 0 }
 0x325   : > { %v3722_v34 = vpop.f32.mrb[8].mxu1 }
 0x326   : > { %1183 = vmax.xlane.f32.xlu0 %v1182_v35  ;;  %v1408_v37 = vpop.f32.mrb[9].mxu1  ;;  %v1417_v40 = vadd.f32 %v3722_v34, %v3411_v36  ;;  %v3942_v34 = vld [vmem:[%s4702_s11 + $0x20] sm:$0xff]  }
 0x327   : > { %v3723_v38 = vpop.f32.mrb[10].mxu1  ;;  %v1409_v41 = vadd.f32 %v3411_v36, %v1408_v37 }
 0x328   : > { %v1411_v39 = vpop.f32.mrb[11].mxu1  ;;  %v1498_v44 = vpack.c.bf16 %v1417_v40, %v1417_v40 }
 0x329   : > { %v1412_v42 = vadd.f32 %v3411_v36, %v1411_v39 }
 0x32a   : > { %v1509_v46 = vsel %vm1110_vm2, %v1498_v44, 0 }
 0x32b   : > { %v1497_v43 = vpack.c.bf16 %v1412_v42, %v1409_v41 }
 0x32d   : > { %3910 = vmatprep.subr.msk.bf16.mxu1 %vm1110_vm2, %v1497_v43  ;;  %v1506_v45 = vsel %vm1110_vm2, %v1497_v43, 0 }
 0x32e   : > { %3733 = vmatpush3.bf16.xpose.msra.mxu1 %v1506_v45  ;;  %v3943_v45 = vld [vmem:[%s4702_s11 + $0x28] sm:$0xff]  }
 0x32f   : > { %3911 = vmatprep.subr.msk.bf16.mxu1 %vm1110_vm2, %v1498_v44 }
 0x336   : > { %3735 = vmatpush3.bf16.xpose.msra.mxu1 %v1509_v46 }
 0x337   : > { %3913 = vmatprep.subr.msk.bf16.mxu1 %vm1666_vm6, %v1275_v15 }
 0x3af   : > { %v1177_v47 = vpop.xlane.xlu0 %1176 }
 0x3b0   : > { %v1185_v48 = vsub.f32 %v1171_v27, %v1177_v47 }
 0x3b1   : > { %v1180_v51 = vpop.xlane.xlu1 %1179 }
 0x3b2   : > { %v1188_v52 = vmul.f32 1.442695, %v1185_v48  ;;  %v1186_v53 = vsub.f32 %v1172_v31, %v1180_v51  ;;  %v3421_v31 = vld [vmem:[%s4708_s1 + $0x1] ss:$0 sm:$0xff] }
 0x3b3   : > { %v1184_v54 = vpop.xlane.xlu0 %1183 }
 0x3b4   : > { %3976 = vpow2.f32 %v1188_v52  ;;  %v1190_v55 = vmul.f32 1.442695, %v1186_v53  ;;  %v1187_v56 = vsub.f32 %v1173_v30, %v1184_v54 }
 0x3b6   : > { %3978 = vpow2.f32 %v1190_v55  ;;  %v1192_v57 = vmul.f32 1.442695, %v1187_v56 }
 0x3b8   : > { %3980 = vpow2.f32 %v1192_v57 }
 0x3be   : > { %v3977_v58 = vpop.eup %3976 }
 0x3bf   : > { %v1194_v59 = vsel %vm1174_vm4, %v3977_v58, 0.0 }
 0x3c0   : > { %v3979_v60 = vpop.eup %3978  ;;  %1195 = vadd.xlane.f32.xlu1 %v1194_v59 }
 0x3c1   : > { %v1197_v61 = vsel %vm1174_vm4, %v3979_v60, 0.0 }
 0x3c2   : > { %v3981_v62 = vpop.eup %3980  ;;  %1198 = vadd.xlane.f32.xlu0 %v1197_v61 }
 0x3c3   : > { %v1200_v63 = vsel %vm1181_vm5, %v3981_v62, 0.0 }
 0x3c4   : > { %1201 = vadd.xlane.f32.xlu1 %v1200_v63 }
 0x44d   : > { %v1196_v1 = vpop.xlane.xlu1 %1195 }
 0x44e   : > { %3982 = vrcp.f32 %v1196_v1 }
 0x44f   : > { %v1199_v2 = vpop.xlane.xlu0 %1198 }
 0x450   : > { %3984 = vrcp.f32 %v1199_v2 }
 0x451   : > { %v1202_v3 = vpop.xlane.xlu1 %1201 }
 0x452   : > { %3986 = vrcp.f32 %v1202_v3 }
 0x458   : > { %v3983_v4 = vpop.eup %3982 }
 0x459   : > { %v1206_v6 = vmul.f32 %v3983_v4, %v3977_v58 }
 0x45a   : > { %v3985_v5 = vpop.eup %3984 }
 0x45b   : > { %v1207_v7 = vmul.f32 %v3985_v5, %v3979_v60 }
 0x45c   : > { %v3987_v8 = vpop.eup %3986 }
 0x45d   : > { %v1208_v9 = vmul.f32 %v3987_v8, %v3981_v62  ;;  %v1209_v10 = vpack.c.bf16 %v1207_v7, %v1206_v6 }
 0x45f   : > { %3704 = vmatprep.mubr.msk.bf16.mxu0 %vm1174_vm4, %v1209_v10  ;;  %v1210_v11 = vpack.c.bf16 %v1208_v9, %v1208_v9 }
 0x461   : > { %3705 = vmatmul.mubr.msk.bf16.vlgmr.msra.gmra.mrb[8].mxu0 %vm1174_vm4, %v1210_v11 }
 0x462   : > { %3709 = vmatpush3.bf16.msra.mxu0 %v3938_v0  ;;  %3712 = vmatprep.mubr.msk.bf16.mxu0 %vm825_vm0, %v4250_v50  ;;  %v3450_v0 = vld [vmem:[%s4706_s2 + $0x2] ss:$0 sm:$0xff] }
 0x463   : > { %3710 = vmatprep.subr.bf16.mxu0 %v3939_v12 }
 0x466   : > { %3711 = vmatpush3.bf16.msra.mxu0 %v3939_v12 }
 0x467   : > { %3724 = vmatprep.subr.bf16.mxu0 %v3940_v13 }
 0x469   : > { %3713 = vmatmul.mubr.msk.bf16.vlgmr.msra.gmra.mrb[12].mxu0 %vm825_vm0, %v4248_v49 }
 0x46a   : > { %3725 = vmatpush3.bf16.msra.mxu0 %v3940_v13  ;;  %3728 = vmatprep.mubr.msk.bf16.mxu0 %vm825_vm0, %v4250_v50 }
 0x46b   : > { %3726 = vmatprep.subr.bf16.mxu0 %v3941_v14 }
 0x46e   : > { %3727 = vmatpush3.bf16.msra.mxu0 %v3941_v14 }
 0x471   : > { %3729 = vmatmul.mubr.msk.bf16.vlgmr.msra.gmra.mrb[16].mxu0 %vm825_vm0, %v4248_v49 }
 0x534   : > { %v3706_v16 = vpop.f32.mrb[8].mxu0 }
 0x535   : > { %v1259_v18 = vpop.f32.mrb[9].mxu0  ;;  %v1274_v44 = vpack.c.bf16 %v3706_v16, %v3706_v16 }
 0x536   : > { %v3707_v19 = vpop.f32.mrb[10].mxu0 }
 0x537   : > { %v1262_v20 = vpop.f32.mrb[11].mxu0 }
 0x538   : > { %v1273_v21 = vpack.c.bf16 %v1262_v20, %v1259_v18 }
 0x53c   : > { %v3714_v22 = vpop.f32.mrb[12].mxu0 }
 0x53d   : > { %v1335_v24 = vpop.f32.mrb[13].mxu0  ;;  %v1344_v26 = vadd.f32 %v3714_v22, %v3401_v23 }
 0x53e   : > { %v3715_v25 = vpop.f32.mrb[14].mxu0  ;;  %v1336_v28 = vadd.f32 %v3401_v23, %v1335_v24 }
 0x53f   : > { %v1338_v27 = vpop.f32.mrb[15].mxu0  ;;  %v1496_v32 = vpack.c.bf16 %v1344_v26, %v1344_v26 }
 0x540   : > { %v1339_v29 = vadd.f32 %v3401_v23, %v1338_v27  ;;  %v3430_v27 = vld [vmem:[%s4709_s6 + $0x4] sm:$0xf] }
 0x542   : > { %v1495_v30 = vpack.c.bf16 %v1339_v29, %v1336_v28 }
 0x544   : > { %v3730_v35 = vpop.f32.mrb[16].mxu0  ;;  %3736 = vmatprep.mubr.msk.bf16.mxu1 %vm1110_vm2, %v1495_v30 }
 0x545   : > { %v1490_v36 = vadd.f32 %v3730_v35, %v3421_v31  ;;  %v1481_v37 = vpop.f32.mrb[17].mxu0  ;;  %3737 = vmatmul.mubr.msk.bf16.vlgmr.msra.gmra.mrb[12].mxu1 %vm1110_vm2, %v1496_v32 }
 0x546   : > { %v3731_v38 = vpop.f32.mrb[18].mxu0  ;;  %3756 = vmatprep.mubr.msk.bf16.mxu1 %vm1110_vm2, %v1273_v21  ;;  %3755 = vmatpush3.bf16.msra.mxu1 %v1725_v33  ;;  %v1482_v41 = vadd.f32 %v3421_v31, %v1481_v37 }
 0x547   : > { %v1484_v39 = vpop.f32.mrb[19].mxu0  ;;  %3768 = vmatprep.subr.bf16.mxu1 %v3942_v34  ;;  %v1598_v40 = vpack.c.bf16 %v1490_v36, %v1490_v36 }
 0x548   : > { %v1485_v42 = vadd.f32 %v3421_v31, %v1484_v39  ;;  %v1668_v39 = vsel %vm1666_vm6, %v3430_v27, 0 }
 0x549   : > { %v1606_v46 = vand.u32 %v1598_v40, %v4280_v17  ;;  %v3944_v40 = vld [vmem:[%s4701_s29 + $0x20] sm:$0xff]  }
 0x54a   : > { %v1597_v43 = vpack.c.bf16 %v1485_v42, %v1482_v41 }
 0x54c   : > { %3740 = vmatprep.subr.bf16.mxu0 %v1597_v43 }
 0x54d   : > { %3741 = vmatpush3.bf16.msra.mxu0 %v1597_v43  ;;  %3757 = vmatmul.mubr.msk.bf16.vlgmr.msra.gmra.mrb[16].mxu1 %vm1110_vm2, %v1274_v44 }
 0x54e   : > { %3742 = vmatprep.subr.bf16.mxu0 %v1606_v46  ;;  %3769 = vmatpush3.bf16.msra.mxu1 %v3942_v34 }
 0x54f   : > { %3772 = vmatprep.mubr.msk.bf16.mxu1 %vm825_vm0, %v4250_v50  ;;  %3770 = vmatprep.subr.bf16.mxu1 %v3943_v45 }
 0x551   : > { %3743 = vmatpush3.bf16.msra.mxu0 %v1606_v46 }
 0x552   : > { %3771 = vmatpush3.bf16.msra.mxu1 %v3943_v45  ;;  %3912 = vmatprep.subr.msk.bf16.mxu0 %vm1666_vm6, %v3430_v27 }
 0x555   : > { %3773 = vmatmul.mubr.msk.bf16.vlgmr.msra.gmra.mrb[20].mxu1 %vm825_vm0, %v4248_v49 }
 0x618   : > { %v3738_v47 = vpop.f32.mrb[12].mxu1 }
 0x619   : > { %v1545_v48 = vpop.f32.mrb[13].mxu1  ;;  %v1561_v54 = vmul.f32 0.35355338, %v3738_v47  ;;  %v3945_v47 = vld [vmem:[%s4701_s29 + $0x28] sm:$0xff]  }
 0x61a   : > { %v1559_v51 = vmul.f32 0.35355338, %v1545_v48  ;;  %v3739_v52 = vpop.f32.mrb[14].mxu1  ;;  %v3946_v48 = vld [vmem:[%s4703_s10 + $0x20] sm:$0xff]  }
 0x61b   : > { %v1548_v53 = vpop.f32.mrb[15].mxu1  ;;  %v1568_v59 = vsel %vm1181_vm5, %v1561_v54, -inf  ;;  %v3948_v52 = vld [vmem:[%s4701_s29 + $0x30] sm:$0xff]  }
 0x61c   : > { %v1560_v55 = vmul.f32 0.35355338, %v1548_v53  ;;  %v1562_v56 = vsel %vm1174_vm4, %v1559_v51, -inf }
 0x61d   : > { %1563 = vmax.xlane.f32.xlu0 %v1562_v56 }
 0x61e   : > { %v1565_v57 = vsel %vm1174_vm4, %v1560_v55, -inf }
 0x61f   : > { %1566 = vmax.xlane.f32.xlu1 %v1565_v57 }
 0x620   : > { %v4358_v58 = vpop.f32.mrb[16].mxu1 }
 0x621   : > { %1569 = vmax.xlane.f32.xlu0 %v1568_v59  ;;  %v4361_v60 = vpop.f32.mrb[17].mxu1 }
 0x622   : > { %v3759_v61 = vpop.f32.mrb[18].mxu1 }
 0x623   : > { %v4363_v62 = vpop.f32.mrb[19].mxu1 }
 0x628   : > { %v3774_v63 = vpop.f32.mrb[20].mxu1 }
 0x629   : > { %v1907_v1 = vpop.f32.mrb[21].mxu1  ;;  %v1916_v4 = vadd.f32 %v3774_v63, %v3450_v0 }
 0x62a   : > { %v3775_v2 = vpop.f32.mrb[22].mxu1  ;;  %v1908_v5 = vadd.f32 %v3450_v0, %v1907_v1 }
 0x62b   : > { %v1910_v3 = vpop.f32.mrb[23].mxu1  ;;  %v1997_v8 = vpack.c.bf16 %v1916_v4, %v1916_v4 }
 0x62c   : > { %v1911_v6 = vadd.f32 %v3450_v0, %v1910_v3  ;;  %v3440_v0 = vld [vmem:[%s4707_s9 + $0x2] ss:$0 sm:$0xff] }
 0x62d   : > { %v2008_v10 = vsel %vm1110_vm2, %v1997_v8, 0 }
 0x62e   : > { %v1996_v7 = vpack.c.bf16 %v1911_v6, %v1908_v5 }
 0x630   : > { %3914 = vmatprep.subr.msk.bf16.mxu1 %vm1110_vm2, %v1996_v7  ;;  %v2005_v9 = vsel %vm1110_vm2, %v1996_v7, 0 }
 0x631   : > { %3785 = vmatpush3.bf16.xpose.msra.mxu1 %v2005_v9 }
 0x632   : > { %3915 = vmatprep.subr.msk.bf16.mxu1 %vm1110_vm2, %v1997_v8 }
 0x639   : > { %3787 = vmatpush3.bf16.xpose.msra.mxu1 %v2008_v10 }
 0x63a   : > { %3806 = vmatprep.subr.bf16.mxu1 %v3948_v52 }
 0x6aa   : > { %v1564_v11 = vpop.xlane.xlu0 %1563 }
 0x6ab   : > { %v1571_v12 = vsub.f32 %v1559_v51, %v1564_v11  ;;  %v3947_v51 = vld [vmem:[%s4703_s10 + $0x28] sm:$0xff]  }
 0x6ac   : > { %v1567_v13 = vpop.xlane.xlu1 %1566 }
 0x6ad   : > { %v1574_v14 = vmul.f32 1.442695, %v1571_v12  ;;  %v1572_v15 = vsub.f32 %v1560_v55, %v1567_v13  ;;  %v3950_v13 = vld [vmem:[%s4703_s10 + $0x30] sm:$0xff]  }
 0x6ae   : > { %v1570_v16 = vpop.xlane.xlu0 %1569 }
 0x6af   : > { %3988 = vpow2.f32 %v1574_v14  ;;  %v1576_v18 = vmul.f32 1.442695, %v1572_v15  ;;  %v1573_v19 = vsub.f32 %v1561_v54, %v1570_v16 }
 0x6b1   : > { %3990 = vpow2.f32 %v1576_v18  ;;  %v1578_v20 = vmul.f32 1.442695, %v1573_v19  ;;  %v3951_v19 = vld [vmem:[%s4703_s10 + $0x38] sm:$0xff]  }
 0x6b3   : > { %3992 = vpow2.f32 %v1578_v20 }
 0x6b9   : > { %v3989_v21 = vpop.eup %3988 }
 0x6ba   : > { %v1580_v22 = vsel %vm1174_vm4, %v3989_v21, 0.0 }
 0x6bb   : > { %v3991_v23 = vpop.eup %3990  ;;  %1581 = vadd.xlane.f32.xlu1 %v1580_v22 }
 0x6bc   : > { %v1583_v24 = vsel %vm1174_vm4, %v3991_v23, 0.0 }
 0x6bd   : > { %v3993_v25 = vpop.eup %3992  ;;  %1584 = vadd.xlane.f32.xlu0 %v1583_v24 }
 0x6be   : > { %v1586_v26 = vsel %vm1181_vm5, %v3993_v25, 0.0 }
 0x6bf   : > { %1587 = vadd.xlane.f32.xlu1 %v1586_v26 }
 0x748   : > { %v1582_v28 = vpop.xlane.xlu1 %1581 }
 0x749   : > { %3994 = vrcp.f32 %v1582_v28 }
 0x74a   : > { %v1585_v29 = vpop.xlane.xlu0 %1584 }
 0x74b   : > { %3996 = vrcp.f32 %v1585_v29 }
 0x74c   : > { %v1588_v30 = vpop.xlane.xlu1 %1587 }
 0x74d   : > { %3998 = vrcp.f32 %v1588_v30  ;;  %v3477_v30 = vld [vmem:[%s4707_s9 + $0x3] ss:$0 sm:$0xff] }
 0x753   : > { %v3995_v31 = vpop.eup %3994 }
 0x754   : > { %v1592_v33 = vmul.f32 %v3995_v31, %v3989_v21 }
 0x755   : > { %v3997_v32 = vpop.eup %3996 }
 0x756   : > { %v1593_v34 = vmul.f32 %v3997_v32, %v3991_v23 }
 0x757   : > { %v3999_v35 = vpop.eup %3998 }
 0x758   : > { %v1594_v36 = vmul.f32 %v3999_v35, %v3993_v25  ;;  %v1595_v37 = vpack.c.bf16 %v1593_v34, %v1592_v33 }
 0x75a   : > { %3744 = vmatprep.mubr.msk.bf16.mxu0 %vm1174_vm4, %v1595_v37  ;;  %v1596_v38 = vpack.c.bf16 %v1594_v36, %v1594_v36 }
 0x75c   : > { %3745 = vmatmul.mubr.msk.bf16.vlgmr.msra.gmra.mrb[20].mxu0 %vm1174_vm4, %v1596_v38 }
 0x75d   : > { %3749 = vmatpush3.bf16.msra.mxu0 %v1668_v39 }
 0x75e   : > { %3760 = vmatprep.subr.bf16.mxu0 %v3944_v40 }
 0x82f   : > { %v3746_v41 = vpop.f32.mrb[20].mxu0 }
 0x830   : > { %v1642_v42 = vpop.f32.mrb[21].mxu0  ;;  %v1657_v46 = vpack.c.bf16 %v3746_v41, %v3746_v41 }
 0x831   : > { %v3747_v43 = vpop.f32.mrb[22].mxu0 }
 0x832   : > { %v1645_v44 = vpop.f32.mrb[23].mxu0 }
 0x833   : > { %v1656_v45 = vpack.c.bf16 %v1645_v44, %v1642_v42 }
 0x835   : > { %3750 = vmatprep.mubr.msk.bf16.mxu0 %vm1110_vm2, %v1656_v45 }
 0x836   : > { %3751 = vmatmul.mubr.msk.bf16.vlgmr.msra.gmra.mrb[24].mxu0 %vm1110_vm2, %v1657_v46 }
 0x837   : > { %3761 = vmatpush3.bf16.msra.mxu0 %v3944_v40  ;;  %3764 = vmatprep.mubr.msk.bf16.mxu0 %vm825_vm0, %v4250_v50  ;;  %v3497_v40 = vld [vmem:[%s4708_s1 + $0x3] ss:$0 sm:$0xff] }
 0x838   : > { %3762 = vmatprep.subr.bf16.mxu0 %v3945_v47 }
 0x83b   : > { %3763 = vmatpush3.bf16.msra.mxu0 %v3945_v47 }
 0x83c   : > { %3776 = vmatprep.subr.bf16.mxu0 %v3946_v48 }
 0x83e   : > { %3765 = vmatmul.mubr.msk.bf16.vlgmr.msra.gmra.mrb[28].mxu0 %vm825_vm0, %v4248_v49 }
 0x83f   : > { %3777 = vmatpush3.bf16.msra.mxu0 %v3946_v48  ;;  %3780 = vmatprep.mubr.msk.bf16.mxu0 %vm825_vm0, %v4250_v50 }
 0x840   : > { %3778 = vmatprep.subr.bf16.mxu0 %v3947_v51 }
 0x843   : > { %3779 = vmatpush3.bf16.msra.mxu0 %v3947_v51 }
 0x846   : > { %3781 = vmatmul.mubr.msk.bf16.vlgmr.msra.gmra.mrb[32].mxu0 %vm825_vm0, %v4248_v49 }
 0x909   : > { %v3752_v53 = vpop.f32.mrb[24].mxu0 }
 0x90a   : > { %v4408_v54 = vadd.f32 %v4358_v58, %v3752_v53  ;;  %v1704_v55 = vpop.f32.mrb[25].mxu0 }
 0x90b   : > { %v4411_v56 = vadd.f32 %v4361_v60, %v1704_v55  ;;  %v3753_v57 = vpop.f32.mrb[26].mxu0  ;;  %v3460_v60 = vld [vmem:[%s4708_s1 + $0x2] ss:$0 sm:$0xff]  ;;  %s4710_s1 = sld [smem:[#allocation13_spill]] }
 0x90c   : > { %v1707_v59 = vpop.f32.mrb[27].mxu0 }
 0x90d   : > { %v4414_v61 = vadd.f32 %v4363_v62, %v1707_v59  ;;  %v3949_v62 = vld [vmem:[%s4701_s29 + $0x38] sm:$0xff]  }
 0x911   : > { %v3766_v63 = vpop.f32.mrb[28].mxu0 }
 0x912   : > { %v1834_v1 = vpop.f32.mrb[29].mxu0  ;;  %v1843_v3 = vadd.f32 %v3766_v63, %v3440_v0 }
 0x913   : > { %v3767_v2 = vpop.f32.mrb[30].mxu0  ;;  %v1835_v58 = vadd.f32 %v3440_v0, %v1834_v1 }
 0x914   : > { %v1837_v4 = vpop.f32.mrb[31].mxu0  ;;  %v1995_v7 = vpack.c.bf16 %v1843_v3, %v1843_v3 }
 0x915   : > { %v1838_v5 = vadd.f32 %v3440_v0, %v1837_v4 }
 0x917   : > { %v1994_v6 = vpack.c.bf16 %v1838_v5, %v1835_v58 }
 0x919   : > { %v3782_v8 = vpop.f32.mrb[32].mxu0  ;;  %3788 = vmatprep.mubr.msk.bf16.mxu1 %vm1110_vm2, %v1994_v6 }
 0x91a   : > { %v1989_v9 = vadd.f32 %v3782_v8, %v3460_v60  ;;  %v1980_v10 = vpop.f32.mrb[33].mxu0  ;;  %3789 = vmatmul.mubr.msk.bf16.vlgmr.msra.gmra.mrb[24].mxu1 %vm1110_vm2, %v1995_v7  ;;  %v3469_v7 = vld [vmem:[%s4709_s6 + $0x8] sm:$0xf] }
 0x91b   : > { %v3783_v11 = vpop.f32.mrb[34].mxu0  ;;  %3807 = vmatpush3.bf16.msra.mxu1 %v3948_v52  ;;  %3810 = vmatprep.mubr.msk.bf16.mxu1 %vm825_vm0, %v4250_v50  ;;  %v1981_v15 = vadd.f32 %v3460_v60, %v1980_v10 }
 0x91c   : > { %v1983_v12 = vpop.f32.mrb[35].mxu0  ;;  %3808 = vmatprep.subr.bf16.mxu1 %v3949_v62  ;;  %v2097_v14 = vpack.c.bf16 %v1989_v9, %v1989_v9 }
 0x91d   : > { %v1984_v16 = vadd.f32 %v3460_v60, %v1983_v12 }
 0x91e   : > { %v2105_v20 = vand.u32 %v2097_v14, %v4280_v17 }
 0x91f   : > { %v2096_v18 = vpack.c.bf16 %v1984_v16, %v1981_v15  ;;  %3809 = vmatpush3.bf16.msra.mxu1 %v3949_v62 }
 0x920   : > { %3822 = vmatprep.subr.bf16.mxu1 %v3950_v13 }
 0x921   : > { %3792 = vmatprep.subr.bf16.mxu0 %v2096_v18 }
 0x922   : > { %3793 = vmatpush3.bf16.msra.mxu0 %v2096_v18  ;;  %3811 = vmatmul.mubr.msk.bf16.vlgmr.msra.gmra.mrb[28].mxu1 %vm825_vm0, %v4248_v49 }
 0x923   : > { %3794 = vmatprep.subr.bf16.mxu0 %v2105_v20  ;;  %3823 = vmatpush3.bf16.msra.mxu1 %v3950_v13 }
 0x924   : > { %3826 = vmatprep.mubr.msk.bf16.mxu1 %vm825_vm0, %v4250_v50  ;;  %3824 = vmatprep.subr.bf16.mxu1 %v3951_v19 }
 0x926   : > { %3795 = vmatpush3.bf16.msra.mxu0 %v2105_v20  ;;  %v3952_v20 = vld [vmem:[%s4702_s11 + $0x30] sm:$0xff]  }
 0x927   : > { %3825 = vmatpush3.bf16.msra.mxu1 %v3951_v19  ;;  %3916 = vmatprep.subr.msk.bf16.mxu0 %vm1666_vm6, %v3469_v7  ;;  %v2166_v19 = vsel %vm1666_vm6, %v3469_v7, 0 }
 0x92a   : > { %3827 = vmatmul.mubr.msk.bf16.vlgmr.msra.gmra.mrb[32].mxu1 %vm825_vm0, %v4248_v49 }
 0x9ed   : > { %v3790_v21 = vpop.f32.mrb[24].mxu1 }
 0x9ee   : > { %v2044_v22 = vpop.f32.mrb[25].mxu1  ;;  %v2060_v26 = vmul.f32 0.35355338, %v3790_v21 }
 0x9ef   : > { %v2058_v23 = vmul.f32 0.35355338, %v2044_v22  ;;  %v3791_v24 = vpop.f32.mrb[26].mxu1 }
 0x9f0   : > { %v2047_v25 = vpop.f32.mrb[27].mxu1  ;;  %v2067_v32 = vsel %vm1181_vm5, %v2060_v26, -inf }
 0x9f1   : > { %v2059_v27 = vmul.f32 0.35355338, %v2047_v25  ;;  %v2061_v28 = vsel %vm1174_vm4, %v2058_v23, -inf }
 0x9f2   : > { %2062 = vmax.xlane.f32.xlu0 %v2061_v28 }
 0x9f3   : > { %v2064_v29 = vsel %vm1174_vm4, %v2059_v27, -inf }
 0x9f4   : > { %2065 = vmax.xlane.f32.xlu1 %v2064_v29 }
 0x9f5   : > { %v3812_v31 = vpop.f32.mrb[28].mxu1 }
 0x9f6   : > { %v4448_v33 = vadd.f32 %v3812_v31, %v3477_v30  ;;  %2068 = vmax.xlane.f32.xlu0 %v2067_v32  ;;  %v2278_v34 = vpop.f32.mrb[29].mxu1 }
 0x9f7   : > { %v3813_v35 = vpop.f32.mrb[30].mxu1  ;;  %v4450_v37 = vadd.f32 %v3477_v30, %v2278_v34 }
 0x9f8   : > { %v2281_v36 = vpop.f32.mrb[31].mxu1 }
 0x9f9   : > { %v4452_v38 = vadd.f32 %v3477_v30, %v2281_v36 }
 0x9fb   : > { %v2438_v39 = vpack.c.bf16 %v4452_v38, %v4450_v37 }
 0x9fd   : > { %v3828_v41 = vpop.f32.mrb[32].mxu1 }
 0x9fe   : > { %v2433_v42 = vadd.f32 %v3828_v41, %v3497_v40  ;;  %v2424_v43 = vpop.f32.mrb[33].mxu1 }
 0x9ff   : > { %v3829_v44 = vpop.f32.mrb[34].mxu1  ;;  %v2425_v47 = vadd.f32 %v3497_v40, %v2424_v43  ;;  %v2439_v43 = vpack.c.bf16 %v4448_v33, %v4448_v33 }
 0xa00   : > { %v2427_v45 = vpop.f32.mrb[35].mxu1  ;;  %v2541_v46 = vpack.c.bf16 %v2433_v42, %v2433_v42 }
 0xa01   : > { %v2428_v48 = vadd.f32 %v3497_v40, %v2427_v45 }
 0xa02   : > { %v2549_v52 = vand.u32 %v2541_v46, %v4280_v17 }
 0xa03   : > { %v2540_v51 = vpack.c.bf16 %v2428_v48, %v2425_v47 }
 0xa05   : > { %3838 = vmatprep.subr.bf16.mxu1 %v2540_v51 }
 0xa06   : > { %3839 = vmatpush3.bf16.msra.mxu1 %v2540_v51 }
 0xa07   : > { %3840 = vmatprep.subr.bf16.mxu1 %v2549_v52 }
 0xa0a   : > { %3841 = vmatpush3.bf16.msra.mxu1 %v2549_v52 }
 0xa7f   : > { %v2063_v53 = vpop.xlane.xlu0 %2062 }
 0xa80   : > { %v2070_v55 = vsub.f32 %v2058_v23, %v2063_v53 }
 0xa81   : > { %v2066_v57 = vpop.xlane.xlu1 %2065 }
 0xa82   : > { %v2073_v59 = vmul.f32 1.442695, %v2070_v55  ;;  %v2071_v63 = vsub.f32 %v2059_v27, %v2066_v57  ;;  %v3953_v27 = vld [vmem:[%s4702_s11 + $0x38] sm:$0xff]  }
 0xa83   : > { %v2069_v0 = vpop.xlane.xlu0 %2068 }
 0xa84   : > { %4000 = vpow2.f32 %v2073_v59  ;;  %v2075_v1 = vmul.f32 1.442695, %v2071_v63  ;;  %v2072_v2 = vsub.f32 %v2060_v26, %v2069_v0 }
 0xa86   : > { %4002 = vpow2.f32 %v2075_v1  ;;  %v2077_v3 = vmul.f32 1.442695, %v2072_v2 }
 0xa88   : > { %4004 = vpow2.f32 %v2077_v3 }
 0xa8e   : > { %v4001_v4 = vpop.eup %4000 }
 0xa8f   : > { %v2079_v58 = vsel %vm1174_vm4, %v4001_v4, 0.0 }
 0xa90   : > { %v4003_v17 = vpop.eup %4002  ;;  %2080 = vadd.xlane.f32.xlu1 %v2079_v58 }
 0xa91   : > { %v2082_v5 = vsel %vm1174_vm4, %v4003_v17, 0.0 }
 0xa92   : > { %v4005_v6 = vpop.eup %4004  ;;  %2083 = vadd.xlane.f32.xlu0 %v2082_v5 }
 0xa93   : > { %v2085_v60 = vsel %vm1181_vm5, %v4005_v6, 0.0 }
 0xa94   : > { %2086 = vadd.xlane.f32.xlu1 %v2085_v60 }
 0xb1d   : > { %v2081_v62 = vpop.xlane.xlu1 %2080 }
 0xb1e   : > { %4006 = vrcp.f32 %v2081_v62 }
 0xb1f   : > { %v2084_v8 = vpop.xlane.xlu0 %2083 }
 0xb20   : > { %4008 = vrcp.f32 %v2084_v8  ;;  %v3506_v8 = vld [vmem:[%s4709_s6 + $0xc] sm:$0xf] }
 0xb21   : > { %v2087_v9 = vpop.xlane.xlu1 %2086  ;;  %3919 = vmatprep.subr.msk.bf16.mxu1 %vm1666_vm6, %v3506_v8 }
 0xb22   : > { %4010 = vrcp.f32 %v2087_v9 }
 0xb28   : > { %v4007_v10 = vpop.eup %4006 }
 0xb29   : > { %v2091_v12 = vmul.f32 %v4007_v10, %v4001_v4 }
 0xb2a   : > { %v4009_v11 = vpop.eup %4008 }
 0xb2b   : > { %v2092_v13 = vmul.f32 %v4009_v11, %v4003_v17 }
 0xb2c   : > { %v4011_v14 = vpop.eup %4010 }
 0xb2d   : > { %v2093_v15 = vmul.f32 %v4011_v14, %v4005_v6  ;;  %v2094_v16 = vpack.c.bf16 %v2092_v13, %v2091_v12 }
 0xb2f   : > { %3796 = vmatprep.mubr.msk.bf16.mxu0 %vm1174_vm4, %v2094_v16  ;;  %v2095_v18 = vpack.c.bf16 %v2093_v15, %v2093_v15 }
 0xb31   : > { %3797 = vmatmul.mubr.msk.bf16.vlgmr.msra.gmra.mrb[36].mxu0 %vm1174_vm4, %v2095_v18 }
 0xb32   : > { %3801 = vmatpush3.bf16.msra.mxu0 %v2166_v19 }
 0xb33   : > { %3814 = vmatprep.subr.bf16.mxu0 %v3952_v20 }
 0xc04   : > { %v3798_v21 = vpop.f32.mrb[36].mxu0 }
 0xc05   : > { %v2141_v22 = vpop.f32.mrb[37].mxu0  ;;  %v2156_v26 = vpack.c.bf16 %v3798_v21, %v3798_v21  ;;  %v2610_v21 = vsel %vm1666_vm6, %v3506_v8, 0 }
 0xc06   : > { %v3799_v23 = vpop.f32.mrb[38].mxu0 }
 0xc07   : > { %v2144_v24 = vpop.f32.mrb[39].mxu0 }
 0xc08   : > { %v2155_v25 = vpack.c.bf16 %v2144_v24, %v2141_v22 }
 0xc0a   : > { %3802 = vmatprep.mubr.msk.bf16.mxu0 %vm1110_vm2, %v2155_v25 }
 0xc0b   : > { %3803 = vmatmul.mubr.msk.bf16.vlgmr.msra.gmra.mrb[40].mxu0 %vm1110_vm2, %v2156_v26 }
 0xc0c   : > { %3815 = vmatpush3.bf16.msra.mxu0 %v3952_v20  ;;  %3818 = vmatprep.mubr.msk.bf16.mxu0 %vm825_vm0, %v4250_v50 }
 0xc0d   : > { %3816 = vmatprep.subr.bf16.mxu0 %v3953_v27 }
 0xc10   : > { %3817 = vmatpush3.bf16.msra.mxu0 %v3953_v27 }
 0xc13   : > { %3819 = vmatmul.mubr.msk.bf16.vlgmr.msra.gmra.mrb[44].mxu0 %vm825_vm0, %v4248_v49  ;;  %v3487_v49 = vld [vmem:[%s4706_s2 + $0x3] ss:$0 sm:$0xff] }
 0xc14   : > { %3834 = vmatprep.mubr.msk.bf16.mxu0 %vm1110_vm2, %v2438_v39 }
 0xcde   : > { %v3804_v28 = vpop.f32.mrb[40].mxu0 }
 0xcdf   : > { %v4487_v29 = vadd.f32 %v3804_v28, %v4408_v54  ;;  %v2202_v30 = vpop.f32.mrb[41].mxu0  ;;  %v3954_v28 = vld [vmem:[%s4661_s12] sm:$0xff]  }
 0xce0   : > { %v4490_v31 = vadd.f32 %v2202_v30, %v4411_v56  ;;  %v3805_v32 = vpop.f32.mrb[42].mxu0  ;;  %v3955_v30 = vld [vmem:[%s4661_s12 + $0x8] sm:$0xff]  }
 0xce1   : > { %v2205_v50 = vpop.f32.mrb[43].mxu0 }
 0xce2   : > { %v4493_v34 = vadd.f32 %v2205_v50, %v4414_v61 }
 0xce6   : > { %v3820_v35 = vpop.f32.mrb[44].mxu0 }
 0xce7   : > { %v2351_v36 = vpop.f32.mrb[45].mxu0  ;;  %v2360_v39 = vadd.f32 %v3820_v35, %v3487_v49 }
 0xce8   : > { %v3821_v37 = vpop.f32.mrb[46].mxu0  ;;  %v2352_v54 = vadd.f32 %v3487_v49, %v2351_v36 }
 0xce9   : > { %v2354_v38 = vpop.f32.mrb[47].mxu0  ;;  %v2441_v42 = vpack.c.bf16 %v2360_v39, %v2360_v39 }
 0xcea   : > { %v2355_v40 = vadd.f32 %v3487_v49, %v2354_v38  ;;  %v3509_v49 = vld [vmem:[%s4710_s1] ss:$0 sm:$0xff] }
 0xceb   : > { %v2452_v61 = vsel %vm1110_vm2, %v2441_v42, 0 }
 0xcec   : > { %v2440_v41 = vpack.c.bf16 %v2355_v40, %v2352_v54 }
 0xcee   : > { %3917 = vmatprep.subr.msk.bf16.mxu0 %vm1110_vm2, %v2440_v41  ;;  %v2449_v56 = vsel %vm1110_vm2, %v2440_v41, 0 }
 0xcef   : > { %3831 = vmatpush3.bf16.xpose.msra.mxu0 %v2449_v56 }
 0xcf0   : > { %3918 = vmatprep.subr.msk.bf16.mxu0 %vm1110_vm2, %v2441_v42 }
 0xcf7   : > { %3833 = vmatpush3.bf16.xpose.msra.mxu0 %v2452_v61 }
 0xcf8   : > { %3852 = vmatprep.subr.bf16.mxu0 %v3954_v28 }
 0xcfe   : > { %3835 = vmatmul.mubr.msk.bf16.vlgmr.msra.gmra.mrb[48].mxu0 %vm1110_vm2, %v2439_v43 }
 0xcff   : > { %3853 = vmatpush3.bf16.msra.mxu0 %v3954_v28 }
 0xd00   : > { %3854 = vmatprep.subr.bf16.mxu0 %v3955_v30 }
 0xd03   : > { %3855 = vmatpush3.bf16.msra.mxu0 %v3955_v30 }
 0xdd1   : > { %v3836_v44 = vpop.f32.mrb[48].mxu0 }
 0xdd2   : > { %v2488_v45 = vpop.f32.mrb[49].mxu0  ;;  %v2504_v51 = vmul.f32 0.35355338, %v3836_v44 }
 0xdd3   : > { %v2502_v46 = vmul.f32 0.35355338, %v2488_v45  ;;  %v3837_v47 = vpop.f32.mrb[50].mxu0 }
 0xdd4   : > { %v2491_v48 = vpop.f32.mrb[51].mxu0  ;;  %v2511_v57 = vsel %vm1181_vm5, %v2504_v51, -inf }
 0xdd5   : > { %v2503_v52 = vmul.f32 0.35355338, %v2491_v48  ;;  %v2505_v53 = vsel %vm1174_vm4, %v2502_v46, -inf }
 0xdd6   : > { %2506 = vmax.xlane.f32.xlu0 %v2505_v53 }
 0xdd7   : > { %v2508_v55 = vsel %vm1174_vm4, %v2503_v52, -inf }
 0xdd8   : > { %2509 = vmax.xlane.f32.xlu1 %v2508_v55 }
 0xdda   : > { %2512 = vmax.xlane.f32.xlu0 %v2511_v57 }
 0xe63   : > { %v2507_v59 = vpop.xlane.xlu0 %2506 }
 0xe64   : > { %v2514_v33 = vsub.f32 %v2502_v46, %v2507_v59 }
 0xe65   : > { %v2510_v63 = vpop.xlane.xlu1 %2509 }
 0xe66   : > { %v2517_v0 = vmul.f32 1.442695, %v2514_v33  ;;  %v2515_v1 = vsub.f32 %v2503_v52, %v2510_v63 }
 0xe67   : > { %v2513_v2 = vpop.xlane.xlu0 %2512 }
 0xe68   : > { %4012 = vpow2.f32 %v2517_v0  ;;  %v2519_v3 = vmul.f32 1.442695, %v2515_v1  ;;  %v2516_v4 = vsub.f32 %v2504_v51, %v2513_v2 }
 0xe6a   : > { %4014 = vpow2.f32 %v2519_v3  ;;  %v2521_v58 = vmul.f32 1.442695, %v2516_v4 }
 0xe6c   : > { %4016 = vpow2.f32 %v2521_v58 }
 0xe72   : > { %v4013_v17 = vpop.eup %4012 }
 0xe73   : > { %v2523_v5 = vsel %vm1174_vm4, %v4013_v17, 0.0 }
 0xe74   : > { %v4015_v6 = vpop.eup %4014  ;;  %2524 = vadd.xlane.f32.xlu1 %v2523_v5 }
 0xe75   : > { %v2526_v60 = vsel %vm1174_vm4, %v4015_v6, 0.0 }
 0xe76   : > { %v4017_v7 = vpop.eup %4016  ;;  %2527 = vadd.xlane.f32.xlu0 %v2526_v60 }
 0xe77   : > { %v2529_v62 = vsel %vm1181_vm5, %v4017_v7, 0.0 }
 0xe78   : > { %2530 = vadd.xlane.f32.xlu1 %v2529_v62 }
 0xf01   : > { %v2525_v9 = vpop.xlane.xlu1 %2524 }
 0xf02   : > { %4018 = vrcp.f32 %v2525_v9 }
 0xf03   : > { %v2528_v10 = vpop.xlane.xlu0 %2527 }
 0xf04   : > { %4020 = vrcp.f32 %v2528_v10 }
 0xf05   : > { %v2531_v11 = vpop.xlane.xlu1 %2530 }
 0xf06   : > { %4022 = vrcp.f32 %v2531_v11  ;;  %v3519_v11 = vld [vmem:[%s4711_s0] ss:$0 sm:$0xff] }
 0xf0c   : > { %v4019_v12 = vpop.eup %4018 }
 0xf0d   : > { %v2535_v14 = vmul.f32 %v4019_v12, %v4013_v17 }
 0xf0e   : > { %v4021_v13 = vpop.eup %4020 }
 0xf0f   : > { %v2536_v15 = vmul.f32 %v4021_v13, %v4015_v6  ;;  %v3515_v6 = vld [vmem:[%s4664_s15] ss:$0 sm:$0xff] }
 0xf10   : > { %v4023_v16 = vpop.eup %4022 }
 0xf11   : > { %v2537_v18 = vmul.f32 %v4023_v16, %v4017_v7  ;;  %v2538_v19 = vpack.c.bf16 %v2536_v15, %v2535_v14 }
 0xf13   : > { %3842 = vmatprep.mubr.msk.bf16.mxu1 %vm1174_vm4, %v2538_v19  ;;  %v2539_v20 = vpack.c.bf16 %v2537_v18, %v2537_v18 }
 0xf15   : > { %3843 = vmatmul.mubr.msk.bf16.vlgmr.msra.gmra.mrb[36].mxu1 %vm1174_vm4, %v2539_v20  ;;  %v4048_v20 = vld [vmem:[%s4216_s28] sm:$0xff] }
 0xf16   : > { %3847 = vmatpush3.bf16.msra.mxu1 %v2610_v21 }
 0xfe8   : > { %v3844_v22 = vpop.f32.mrb[36].mxu1 }
 0xfe9   : > { %v2585_v23 = vpop.f32.mrb[37].mxu1  ;;  %v2600_v27 = vpack.c.bf16 %v3844_v22, %v3844_v22 }
 0xfea   : > { %v3845_v24 = vpop.f32.mrb[38].mxu1 }
 0xfeb   : > { %v2588_v25 = vpop.f32.mrb[39].mxu1 }
 0xfec   : > { %v2599_v26 = vpack.c.bf16 %v2588_v25, %v2585_v23  ;;  %v4049_v23 = vld [vmem:[%s4216_s28 + $0x8] sm:$0xff]  ;;  %v4050_v25 = vld [vmem:[%s4216_s28 + $0x10] sm:$0x1]  ;;  %s4712_s28 = smul.u32 24, %s4715_s4 }
 0xfee   : > { %3848 = vmatprep.mubr.msk.bf16.mxu1 %vm1110_vm2, %v2599_v26  ;;  %s818_s8 = scalar_lea.vmem %s4676_s27, %s4712_s28 }
 0xfef   : > { %3849 = vmatmul.mubr.msk.bf16.vlgmr.msra.gmra.mrb[40].mxu1 %vm1110_vm2, %v2600_v27 }
0x10c2   : > { %v3850_v32 = vpop.f32.mrb[40].mxu1 }
0x10c3   : > { %v2662_v50 = vadd.f32 %v3850_v32, %v4487_v29  ;;  %v2646_v35 = vpop.f32.mrb[41].mxu1  ;;  %v3956_v29 = vld [vmem:[%s4663_s14] sm:$0xff]  }
0x10c4   : > { %v2660_v36 = vadd.f32 %v2646_v35, %v4490_v31  ;;  %v3851_v37 = vpop.f32.mrb[42].mxu1  ;;  %3860 = vmatprep.subr.bf16.mxu1 %v3956_v29  ;;  %v3510_v31 = vld [vmem:[%s4662_s13] ss:$0 sm:$0xff] }
0x10c5   : > { %v2649_v38 = vpop.f32.mrb[43].mxu1  ;;  %v2672_v54 = vadd.f32 %v3509_v49, %v2662_v50  ;;  %3861 = vmatpush3.bf16.msra.mxu1 %v3956_v29 }
0x10c6   : > { %v2661_v39 = vadd.f32 %v2649_v38, %v4493_v34  ;;  %v2670_v40 = vadd.f32 %v3509_v49, %v2660_v36 }
0x10c7   : > { %v2674_v56 = vpack.c.bf16 %v2672_v54, %v2672_v54 }
0x10c8   : > { %v2671_v41 = vadd.f32 %v3509_v49, %v2661_v39 }
0x10ca   : > { %v2673_v42 = vpack.c.bf16 %v2671_v41, %v2670_v40 }
0x10cc   : > { %3856 = vmatprep.mubr.msk.bf16.mxu0 %vm825_vm0, %v2673_v42 }
0x10cd   : > { %3857 = vmatmul.mubr.msk.bf16.vlgmr.msra.gmra.mrb[52].mxu0 %vm825_vm0, %v2674_v56 }
0x11a0   : > { %v3858_v34 = vpop.f32.mrb[52].mxu0 }
0x11a1   : > { %v2747_v61 = vadd.f32 %v3858_v34, %v3510_v31  ;;  %v2738_v43 = vpop.f32.mrb[53].mxu0  ;;  %v3958_v34 = vld [vmem:[%s4667_s18 + $0x8] sm:$0xff]  }
0x11a2   : > { %v2739_v44 = vadd.f32 %v3510_v31, %v2738_v43  ;;  %v3859_v45 = vpop.f32.mrb[54].mxu0  ;;  %v3960_v43 = vld [vmem:[%s4669_s20 + $0x8] sm:$0xff]  }
0x11a3   : > { %v2757_v46 = vmul.f32 0.70710677, %v2747_v61  ;;  %v2741_v47 = vpop.f32.mrb[55].mxu0  ;;  %v2754_v63 = vmul.f32 0.5, %v2747_v61  ;;  %v3959_v61 = vld [vmem:[%s4669_s20] sm:$0xff]  }
0x11a4   : > { %v2755_v48 = vmul.f32 0.70710677, %v2739_v44  ;;  %v2742_v51 = vadd.f32 %v3510_v31, %v2741_v47  ;;  %v2752_v0 = vmul.f32 0.5, %v2739_v44  ;;  %v3957_v31 = vld [vmem:[%s4667_s18] sm:$0xff]   ;;  %3874 = vmatprep.subr.bf16.mxu1 %v3959_v61 }
0x11a5   : > { %4024 = verf.f32 %v2757_v46  ;;  %3866 = vmatprep.subr.bf16.mxu0 %v3957_v31 }
0x11a6   : > { %4026 = verf.f32 %v2755_v48  ;;  %v2756_v52 = vmul.f32 0.70710677, %v2742_v51  ;;  %v2753_v1 = vmul.f32 0.5, %v2742_v51  ;;  %3867 = vmatpush3.bf16.msra.mxu0 %v3957_v31  ;;  %v3968_v31 = vld [vmem:[%s4672_s23 + $0x8] sm:$0xff]  }
0x11a7   : > { %3868 = vmatprep.subr.bf16.mxu0 %v3958_v34 }
0x11a8   : > { %4028 = verf.f32 %v2756_v52 }
0x11aa   : > { %3869 = vmatpush3.bf16.msra.mxu0 %v3958_v34 }
0x11af   : > { %v4025_v53 = vpop.eup %4024 }
0x11b0   : > { %v4027_v55 = vpop.eup %4026  ;;  %v2763_v57 = vadd.f32 1.0, %v4025_v53 }
0x11b1   : > { %v2761_v59 = vadd.f32 1.0, %v4027_v55 }
0x11b2   : > { %v4029_v33 = vpop.eup %4028  ;;  %v2766_v3 = vmul.f32 %v2763_v57, %v2754_v63 }
0x11b3   : > { %v2762_v2 = vadd.f32 1.0, %v4029_v33  ;;  %v2764_v4 = vmul.f32 %v2761_v59, %v2752_v0  ;;  %v3520_v59 = vld [vmem:[%s4665_s16] ss:$0 sm:$0xff] }
0x11b4   : > { %v2768_v5 = vpack.c.bf16 %v2766_v3, %v2766_v3  ;;  %v3521_v3 = vld [vmem:[%s4666_s17] ss:$0 sm:$0xff] }
0x11b5   : > { %v2765_v58 = vmul.f32 %v2762_v2, %v2753_v1 }
0x11b7   : > { %v2767_v17 = vpack.c.bf16 %v2765_v58, %v2764_v4 }
0x11b9   : > { %3862 = vmatprep.mubr.msk.bf16.mxu1 %vm2784_vm7, %v2767_v17 }
0x11ba   : > { %3863 = vmatmul.mubr.msk.bf16.vlgmr.msra.gmra.mrb[44].mxu1 %vm2784_vm7, %v2768_v5 }
0x11bb   : > { %3875 = vmatpush3.bf16.msra.mxu1 %v3959_v61  ;;  %v3527_v61 = vld [vmem:[%s4670_s21] ss:$0 sm:$0xff] }
0x11bc   : > { %3876 = vmatprep.subr.bf16.mxu1 %v3960_v43 }
0x11bf   : > { %3877 = vmatpush3.bf16.msra.mxu1 %v3960_v43 }
0x128d   : > { %v3864_v60 = vpop.f32.mrb[44].mxu1 }
0x128e   : > { %v2834_v7 = vadd.f32 %v3864_v60, %v3515_v6  ;;  %v2825_v62 = vpop.f32.mrb[45].mxu1 }
0x128f   : > { %v2826_v8 = vadd.f32 %v3515_v6, %v2825_v62  ;;  %v3865_v9 = vpop.f32.mrb[46].mxu1 }
0x1290   : > { %v2841_v10 = vadd.f32 %v2834_v7, %v2672_v54  ;;  %v2828_v12 = vpop.f32.mrb[47].mxu1  ;;  %v3962_v9 = vld [vmem:[%s4669_s20 + $0x18] sm:$0xff]  }
0x1291   : > { %v2839_v13 = vadd.f32 %v2826_v8, %v2670_v40  ;;  %v2829_v14 = vadd.f32 %v3515_v6, %v2828_v12  ;;  %v3961_v8 = vld [vmem:[%s4669_s20 + $0x10] sm:$0xff]  }
0x1292   : > { %v2851_v15 = vmul.f32 %v3519_v11, %v2841_v10  ;;  %3878 = vmatprep.subr.bf16.mxu1 %v3961_v8  ;;  %v3963_v10 = vld [vmem:[%s4669_s20 + $0x20] sm:$0xff]   ;;  %v3965_v12 = vld [vmem:[%s4669_s20 + $0x30] sm:$0xff]  }
0x1293   : > { %v2849_v16 = vmul.f32 %v3519_v11, %v2839_v13  ;;  %v2840_v18 = vadd.f32 %v2829_v14, %v2671_v41  ;;  %3879 = vmatpush3.bf16.msra.mxu1 %v3961_v8  ;;  %v3966_v13 = vld [vmem:[%s4669_s20 + $0x38] sm:$0xff]   ;;  %v3522_v14 = vld [vmem:[%s4668_s19] ss:$0 sm:$0xff] }
0x1294   : > { %v4557_v26 = vadd.f32 %v4050_v25, %v2851_v15  ;;  %3880 = vmatprep.subr.bf16.mxu1 %v3962_v9 }
0x1295   : > { %v2850_v19 = vmul.f32 %v3519_v11, %v2840_v18  ;;  %v4549_v21 = vadd.f32 %v4048_v20, %v2849_v16  ;;  %v3964_v11 = vld [vmem:[%s4669_s20 + $0x28] sm:$0xff]  }
0x1296   : > { %v2863_v28 = vsel %vm832_vm1, %v4557_v26, 0.0 }
0x1297   : > { %v2857_v22 = vsel %vm825_vm0, %v4549_v21, 0.0  ;;  %v4554_v24 = vadd.f32 %v4049_v23, %v2850_v19  ;;  %3881 = vmatpush3.bf16.msra.mxu1 %v3962_v9 }
0x1298   : > { %2858 = vadd.xlane.f32.xlu0 %v2857_v22  ;;  %3882 = vmatprep.subr.bf16.mxu1 %v3963_v10 }
0x1299   : > { %v2860_v27 = vsel %vm825_vm0, %v4554_v24, 0.0 }
0x129a   : > { %2861 = vadd.xlane.f32.xlu1 %v2860_v27 }
0x129b   : > { %3883 = vmatpush3.bf16.msra.mxu1 %v3963_v10 }
0x129c   : > { %2864 = vadd.xlane.f32.xlu0 %v2863_v28  ;;  %3884 = vmatprep.subr.bf16.mxu1 %v3964_v11 }
0x129f   : > { %3885 = vmatpush3.bf16.msra.mxu1 %v3964_v11 }
0x12a0   : > { %3886 = vmatprep.subr.bf16.mxu1 %v3965_v12 }
0x12a3   : > { %3887 = vmatpush3.bf16.msra.mxu1 %v3965_v12 }
0x12a4   : > { %3888 = vmatprep.subr.bf16.mxu1 %v3966_v13 }
0x12a7   : > { %3889 = vmatpush3.bf16.msra.mxu1 %v3966_v13 }
0x1325   : > { %v2859_v30 = vpop.xlane.xlu0 %2858 }
0x1326   : > { %v2866_v32 = vmul.f32 0.03125, %v2859_v30 }
0x1327   : > { %v2862_v50 = vpop.xlane.xlu1 %2861 }
0x1328   : > { %v2869_v35 = vsub.f32 %v4549_v21, %v2866_v32  ;;  %v2867_v49 = vmul.f32 0.03125, %v2862_v50 }
0x1329   : > { %v2865_v36 = vpop.xlane.xlu0 %2864 }
0x132a   : > { %v2870_v37 = vsub.f32 %v4554_v24, %v2867_v49  ;;  %v2868_v38 = vmul.f32 0.03125, %v2865_v36  ;;  %v2872_v39 = vmul.f32 %v2869_v35, %v2869_v35 }
0x132c   : > { %v2871_v54 = vsub.f32 %v4557_v26, %v2868_v38  ;;  %v2875_v40 = vsel %vm825_vm0, %v2872_v39, 0.0  ;;  %v2873_v41 = vmul.f32 %v2870_v37, %v2870_v37 }
0x132d   : > { %2876 = vadd.xlane.f32.xlu1 %v2875_v40 }
0x132e   : > { %v2878_v42 = vsel %vm825_vm0, %v2873_v41, 0.0  ;;  %v2874_v56 = vmul.f32 %v2871_v54, %v2871_v54 }
0x132f   : > { %2879 = vadd.xlane.f32.xlu0 %v2878_v42 }
0x1330   : > { %v2881_v29 = vsel %vm832_vm1, %v2874_v56, 0.0 }
0x1331   : > { %2882 = vadd.xlane.f32.xlu1 %v2881_v29  ;;  %v3967_v29 = vld [vmem:[%s4672_s23] sm:$0xff]  }
0x1332   : > { %3894 = vmatprep.subr.bf16.mxu0 %v3967_v29 }
0x13ba   : > { %v2877_v44 = vpop.xlane.xlu1 %2876 }
0x13bb   : > { %v2884_v45 = vmul.f32 0.03125, %v2877_v44 }
0x13bc   : > { %v2880_v46 = vpop.xlane.xlu0 %2879 }
0x13bd   : > { %v2887_v47 = vadd.f32 1e-06, %v2884_v45  ;;  %v2885_v48 = vmul.f32 0.03125, %v2880_v46 }
0x13be   : > { %v2883_v51 = vpop.xlane.xlu1 %2882 }
0x13bf   : > { %4030 = vrsqrt.f32 %v2887_v47  ;;  %v2888_v52 = vadd.f32 1e-06, %v2885_v48  ;;  %v2886_v53 = vmul.f32 0.03125, %v2883_v51 }
0x13c1   : > { %4032 = vrsqrt.f32 %v2888_v52  ;;  %v2889_v55 = vadd.f32 1e-06, %v2886_v53  ;;  %v3969_v53 = vld [vmem:[%s4674_s25] sm:$0xff]  }
0x13c3   : > { %4034 = vrsqrt.f32 %v2889_v55  ;;  %v3536_v55 = vld [vmem:[%s4673_s24] ss:$0 sm:$0xff] }
0x13c9   : > { %v4031_v57 = vpop.eup %4030 }
0x13ca   : > { %v2893_v33 = vmul.f32 %v4031_v57, %v2869_v35 }
0x13cb   : > { %v4033_v63 = vpop.eup %4032 }
0x13cc   : > { %v2894_v0 = vmul.f32 %v4033_v63, %v2870_v37  ;;  %v2902_v1 = vmul.f32 %v3520_v59, %v2893_v33 }
0x13cd   : > { %v4035_v2 = vpop.eup %4034 }
0x13ce   : > { %v2895_v4 = vmul.f32 %v4035_v2, %v2871_v54  ;;  %v2903_v58 = vmul.f32 %v3520_v59, %v2894_v0  ;;  %v2911_v5 = vadd.f32 %v3521_v3, %v2902_v1 }
0x13d0   : > { %v2904_v17 = vmul.f32 %v3520_v59, %v2895_v4  ;;  %v2912_v6 = vadd.f32 %v3521_v3, %v2903_v58 }
0x13d2   : > { %v2914_v60 = vpack.c.bf16 %v2912_v6, %v2911_v5  ;;  %v2913_v7 = vadd.f32 %v3521_v3, %v2904_v17 }
0x13d4   : > { %3870 = vmatprep.mubr.msk.bf16.mxu0 %vm825_vm0, %v2914_v60  ;;  %v2915_v62 = vpack.c.bf16 %v2913_v7, %v2913_v7 }
0x13d6   : > { %3871 = vmatmul.mubr.msk.bf16.vlgmr.msra.gmra.mrb[56].mxu0 %vm825_vm0, %v2915_v62 }
0x13d7   : > { %3895 = vmatpush3.bf16.msra.mxu0 %v3967_v29 }
0x13d8   : > { %3896 = vmatprep.subr.bf16.mxu0 %v3968_v31 }
0x13db   : > { %3897 = vmatpush3.bf16.msra.mxu0 %v3968_v31 }
0x13dc   : > { %3902 = vmatprep.subr.bf16.mxu0 %v3969_v53 }
0x14a9   : > { %v3872_v15 = vpop.f32.mrb[56].mxu0 }
0x14aa   : > { %v2988_v16 = vadd.f32 %v3872_v15, %v3522_v14  ;;  %v2979_v18 = vpop.f32.mrb[57].mxu0 }
0x14ab   : > { %v2980_v19 = vadd.f32 %v3522_v14, %v2979_v18  ;;  %v3873_v20 = vpop.f32.mrb[58].mxu0 }
0x14ac   : > { %v2998_v22 = vmul.f32 0.70710677, %v2988_v16  ;;  %v2982_v23 = vpop.f32.mrb[59].mxu0  ;;  %v2995_v36 = vmul.f32 0.5, %v2988_v16  ;;  %v3541_v16 = vld [vmem:[%s4675_s26] ss:$0 sm:$0xff] }
0x14ad   : > { %v2996_v25 = vmul.f32 0.70710677, %v2980_v19  ;;  %v2983_v27 = vadd.f32 %v3522_v14, %v2982_v23  ;;  %v2993_v37 = vmul.f32 0.5, %v2980_v19 }
0x14ae   : > { %4036 = verf.f32 %v2998_v22  ;;  %v3545_v22 = vld [vmem:[%s4671_s22] ss:$0 sm:$0xff] }
0x14af   : > { %4038 = verf.f32 %v2996_v25  ;;  %v2997_v28 = vmul.f32 0.70710677, %v2983_v27  ;;  %v2994_v38 = vmul.f32 0.5, %v2983_v27 }
0x14b1   : > { %4040 = verf.f32 %v2997_v28 }
0x14b8   : > { %v4037_v30 = vpop.eup %4036 }
0x14b9   : > { %v4039_v32 = vpop.eup %4038  ;;  %v3004_v50 = vadd.f32 1.0, %v4037_v30 }
0x14ba   : > { %v3002_v35 = vadd.f32 1.0, %v4039_v32 }
0x14bb   : > { %v4041_v49 = vpop.eup %4040  ;;  %v3007_v54 = vmul.f32 %v3004_v50, %v2995_v36 }
0x14bc   : > { %v3003_v39 = vadd.f32 1.0, %v4041_v49  ;;  %v3005_v40 = vmul.f32 %v3002_v35, %v2993_v37 }
0x14bd   : > { %v3009_v56 = vpack.c.bf16 %v3007_v54, %v3007_v54 }
0x14be   : > { %v3006_v41 = vmul.f32 %v3003_v39, %v2994_v38 }
0x14c0   : > { %v3008_v42 = vpack.c.bf16 %v3006_v41, %v3005_v40 }
0x14c2   : > { %3890 = vmatprep.mubr.bf16.mxu1 %v3008_v42 }
0x14c3   : > { %3891 = vmatmul.mubr.bf16.vlgmr.msra.gmra.mrb[48].mxu1 %v3009_v56 }
0x1596   : > { %v3892_v34 = vpop.f32.mrb[48].mxu1 }
0x1597   : > { %v3115_v43 = vpop.f32.mrb[49].mxu1  ;;  %v3124_v45 = vadd.f32 %v3892_v34, %v3527_v61 }
0x1598   : > { %v3893_v44 = vpop.f32.mrb[50].mxu1  ;;  %v3116_v47 = vadd.f32 %v3527_v61, %v3115_v43 }
0x1599   : > { %v3118_v46 = vpop.f32.mrb[51].mxu1  ;;  %v3130_v52 = vpack.c.bf16 %v3124_v45, %v3124_v45 }
0x159a   : > { %v3119_v48 = vadd.f32 %v3527_v61, %v3118_v46 }
0x159c   : > { %v3129_v51 = vpack.c.bf16 %v3119_v48, %v3116_v47 }
0x159e   : > { %3898 = vmatprep.mubr.msk.bf16.mxu0 %vm825_vm0, %v3129_v51 }
0x159f   : > { %3899 = vmatmul.mubr.msk.bf16.vlgmr.msra.gmra.mrb[60].mxu0 %vm825_vm0, %v3130_v52 }
0x15a0   : > { %3903 = vmatpush3.bf16.msra.mxu0 %v3969_v53 }
0x1672   : > { %v3900_v57 = vpop.f32.mrb[60].mxu0 }
0x1673   : > { %v3203_v59 = vadd.f32 %v3900_v57, %v3536_v55  ;;  %v3194_v33 = vpop.f32.mrb[61].mxu0 }
0x1674   : > { %v3195_v63 = vadd.f32 %v3536_v55, %v3194_v33  ;;  %v3901_v0 = vpop.f32.mrb[62].mxu0 }
0x1675   : > { %v3213_v1 = vmul.f32 0.70710677, %v3203_v59  ;;  %v3197_v2 = vpop.f32.mrb[63].mxu0  ;;  %v3210_v62 = vmul.f32 0.5, %v3203_v59 }
0x1676   : > { %v3211_v3 = vmul.f32 0.70710677, %v3195_v63  ;;  %v3198_v4 = vadd.f32 %v3536_v55, %v3197_v2  ;;  %v3208_v8 = vmul.f32 0.5, %v3195_v63 }
0x1677   : > { %4042 = verf.f32 %v3213_v1 }
0x1678   : > { %4044 = verf.f32 %v3211_v3  ;;  %v3212_v58 = vmul.f32 0.70710677, %v3198_v4  ;;  %v3209_v9 = vmul.f32 0.5, %v3198_v4 }
0x167a   : > { %4046 = verf.f32 %v3212_v58 }
0x1681   : > { %v4043_v17 = vpop.eup %4042 }
0x1682   : > { %v4045_v5 = vpop.eup %4044  ;;  %v3219_v6 = vadd.f32 1.0, %v4043_v17 }
0x1683   : > { %v3217_v60 = vadd.f32 1.0, %v4045_v5 }
0x1684   : > { %v4047_v7 = vpop.eup %4046  ;;  %v3222_v11 = vmul.f32 %v3219_v6, %v3210_v62 }
0x1685   : > { %v3218_v10 = vadd.f32 1.0, %v4047_v7  ;;  %v3220_v12 = vmul.f32 %v3217_v60, %v3208_v8 }
0x1686   : > { %v3224_v15 = vpack.c.bf16 %v3222_v11, %v3222_v11 }
0x1687   : > { %v3221_v13 = vmul.f32 %v3218_v10, %v3209_v9 }
0x1689   : > { %v3223_v14 = vpack.c.bf16 %v3221_v13, %v3220_v12 }
0x168b   : > { %3904 = vmatprep.mubr.msk.bf16.mxu0 %vm2784_vm7, %v3223_v14 }
0x168c   : > { %3905 = vmatmul.mubr.msk.bf16.vlgmr.msra.gmra.mrb[64].mxu0 %vm2784_vm7, %v3224_v15 }
0x175f   : > { %v3906_v18 = vpop.f32.mrb[64].mxu0 }
0x1760   : > { %v3289_v19 = vadd.f32 %v3906_v18, %v3541_v16  ;;  %v3280_v20 = vpop.f32.mrb[65].mxu0 }
0x1761   : > { %v3281_v23 = vadd.f32 %v3541_v16, %v3280_v20  ;;  %v3907_v25 = vpop.f32.mrb[66].mxu0 }
0x1762   : > { %v3296_v27 = vadd.f32 %v3289_v19, %v3124_v45  ;;  %v3283_v28 = vpop.f32.mrb[67].mxu0 }
0x1763   : > { %v3294_v30 = vadd.f32 %v3281_v23, %v3116_v47  ;;  %v3284_v32 = vadd.f32 %v3541_v16, %v3283_v28 }
0x1764   : > { %v3306_v50 = vmul.f32 %v3545_v22, %v3296_v27 }
0x1765   : > { %v3304_v35 = vmul.f32 %v3545_v22, %v3294_v30  ;;  %v3295_v49 = vadd.f32 %v3284_v32, %v3119_v48 }
0x1766   : > { %v3309_v36 = vadd.f32 %v3306_v50, %v4557_v26 }
0x1767   : > { %v3307_v37 = vadd.f32 %v3304_v35, %v4549_v21  ;;  %v3305_v38 = vmul.f32 %v3545_v22, %v3295_v49 }
0x1768   : > { %3312 = vst.msk [vmem:[%s818_s8 + $0x10] sm:$0x1] %vm832_vm1, %v3309_v36 }
0x1769   : > { %3310 = vst.msk [vmem:[%s818_s8] sm:$0xff] %vm825_vm0, %v3307_v37  ;;  %v3308_v39 = vadd.f32 %v3305_v38, %v4554_v24 }
0x176b   : > { %3311 = vst.msk [vmem:[%s818_s8 + $0x8] sm:$0xff] %vm825_vm0, %v3308_v39 }
0x176c PF: > { %s4713_s4 = sld [smem:[#allocation2_spill]] }
0x1772   : > { %s37_s7 = sadd.s32 1, %s4713_s4  }
0x1773   : > { %p34_p4 = scmp.ge.s32.totalorder %s37_s7, 4  }
0x1775   :  { %36 = sbr.rel (!%p34_p4) target bundleno = 13 (0xd), region = 179 }

</bundles_post_ra>
